<compile_context>
chip_gen: v7x
topology: tpu7x:2x2x1
jax: 0.10.0
libtpu: 0.0.40
codegen_flags: <defaults>
</compile_context>

<pallas_src>
import functools

import jax
import jax.numpy as jnp
import numpy as np
from jax.experimental import pallas as pl
from jax.experimental.pallas import tpu as pltpu


def _divisors(n):
    ds = set()
    i = 1
    while i * i <= n:
        if n % i == 0:
            ds.add(i)
            ds.add(n // i)
        i += 1
    return sorted(ds)


def _largest_divisor_leq(n, cap):
    cap = max(1, min(cap, n))
    best = 1
    for d in _divisors(n):
        if d <= cap:
            best = d
    return best


def _vmem_info():
    """(scoped VMEM limit to request, per-block DMA byte target) for this chip."""
    cap = 64 << 20  # conservative fallback: v7x per-core size (v5e/v6e have 128 MiB)
    try:
        info = pltpu.get_tpu_info()
        cap = int(getattr(info, "vmem_capacity_bytes", cap)) or cap
    except Exception:
        pass
    limit = (3 * cap) // 4                       # ~48 MiB on v7x, ~96 MiB on v5e/v6e
    limit = int(min(max(limit, 16 << 20), 112 << 20))
    target = (3 << 20) if cap <= (64 << 20) else (6 << 20)
    return limit, target


def _pick_tiles(N, C, HW, in_itemsize, out_itemsize, K, vmem_limit, target):
    """VMEM-budget-driven (batch tile, channel tile)."""
    # dtype-aware sublane pack for the channel (second-minor) block dim.
    pack = 8 * max(1, 4 // in_itemsize)          # 8 f32, 16 bf16/f16, 32 int8/fp8
    plane4 = HW * 4

    # Channel-tile candidates: divisors of C that are pack multiples (C itself is
    # always legal as a full-dim block).
    ct_opts = [d for d in _divisors(C) if d % pack == 0 or d == C]
    # Aim for ~target bytes per input block, but keep >= 32 channels per step when
    # C allows (keeps accumulator read/write traffic small vs input bytes, v5e).
    cap_ct = max(32, target // max(1, HW * in_itemsize))
    fitting = [d for d in ct_opts if d <= cap_ct]
    Ct = fitting[-1] if fitting else ct_opts[0]

    def usage(nb_, ct_):
        in_b = 2 * nb_ * ct_ * HW * in_itemsize      # double-buffered input
        out_b = 2 * nb_ * HW * out_itemsize          # double-buffered output
        mask_b = 2 * 2 * K * HW * 4                  # double-buffered masks
        acc_b = 2 * nb_ * plane4                     # running sum / max scratch
        fin_b = (2 * K + 8) * nb_ * plane4           # finalize temporaries (generous)
        return in_b + out_b + mask_b + acc_b + fin_b

    # Batch tile: fold batches while the input block stays under target, but keep
    # >= 2 batch blocks whenever N >= 2 (v7x megacore split on the parallel axis).
    cap_nb = max(1, target // max(1, Ct * HW * in_itemsize))
    if N >= 2:
        cap_nb = min(cap_nb, N // 2)
    Nb = _largest_divisor_leq(N, cap_nb)

    # Shrink (batch first, then channel tile) until the working set fits the limit.
    while usage(Nb, Ct) > vmem_limit:
        if Nb > 1:
            Nb = _largest_divisor_leq(N, Nb - 1)
            continue
        smaller = [d for d in ct_opts if d < Ct]
        if not smaller:
            break
        Ct = smaller[-1]
    return Nb, Ct


def _spatial_attention_kernel(x_ref, w_ref, mask_ref, o_ref, sum_ref, max_ref,
                              *, H, W, K, C, pad):
    # x_ref    : (Nb, Ct, HW)  lane-dense channel slab (input dtype)
    # w_ref    : (2*K*K,) f32  flat conv weight in SMEM ([0:K*K]=avg ch, [K*K:]=max ch)
    # mask_ref : (2K, HW) f32  rows [0:K) = per-dj column masks, [K:2K) = per-di row masks
    # o_ref    : (Nb, 1, HW)   output block (same block for every c step)
    # sum_ref  : (Nb, HW) f32  running channel sum  (VMEM scratch)
    # max_ref  : (Nb, HW) f32  running channel max  (VMEM scratch)
    c_idx = pl.program_id(1)
    nc = pl.num_programs(1)
    HW = H * W

    @pl.when(c_idx == 0)
    def _init():
        sum_ref[...] = jnp.zeros_like(sum_ref)
        max_ref[...] = jnp.full_like(max_ref, -jnp.inf)

    x = x_ref[...]                                   # (Nb, Ct, HW) in input dtype
    if x.dtype == jnp.float32:
        sum_ref[...] = sum_ref[...] + jnp.sum(x, axis=1)
        max_ref[...] = jnp.maximum(max_ref[...], jnp.max(x, axis=1))
    else:
        # Sub-32-bit inputs: f32 accumulation without materializing an f32 slab;
        # per-block max reduced in the native dtype, cast once per step.
        sum_ref[...] = sum_ref[...] + jnp.sum(x, axis=1, dtype=jnp.float32)
        max_ref[...] = jnp.maximum(max_ref[...],
                                   jnp.max(x, axis=1).astype(jnp.float32))

    @pl.when(c_idx == nc - 1)
    def _finalize():
        avg = sum_ref[...] * jnp.float32(1.0 / C)    # (Nb, HW) channel mean
        mx = max_ref[...]                            # (Nb, HW) channel max
        masks = mask_ref[...]                        # (2K, HW)

        def lane_roll(v, shift):
            # out[p] = v[(p - shift) mod HW]; static shift -> two static lane
            # slices + one concat (guaranteed Mosaic lowering).
            s = shift % HW
            if s == 0:
                return v
            return jnp.concatenate([v[:, HW - s:], v[:, :HW - s]], axis=1)

        # Column-shifted, column-masked planes: 2K rolls total (vs 2*K*K shifted
        # slices before).  Column validity depends only on dj.
        sm_a = []
        sm_m = []
        for dj in range(K):
            cm = masks[dj:dj + 1, :]
            sm_a.append(lane_roll(avg, pad - dj) * cm)
            sm_m.append(lane_roll(mx, pad - dj) * cm)

        # Per-di: pure-VPU weighted combine of the dj-shifted planes, then one row
        # roll (multiple of W, column-preserving) + row-validity mask.  Exact
        # zero-padding: wrapped columns are killed by cm, wrapped rows by rm.
        acc = jnp.zeros_like(avg)
        for di in range(K):
            row = jnp.zeros_like(avg)
            for dj in range(K):
                row = (row
                       + w_ref[di * K + dj] * sm_a[dj]
                       + w_ref[K * K + di * K + dj] * sm_m[dj])
            row = lane_roll(row, (pad - di) * W)
            rm = masks[K + di:K + di + 1, :]
            acc = acc + rm * row

        o_ref[:, 0, :] = jax.nn.sigmoid(acc).astype(o_ref.dtype)


def spatial_attention(x, weight, kernel_size=7):
    """x: (N, C, H, W); weight: (1, 2, K, K) OIHW, no bias. Returns (N, 1, H, W)."""
    N, C, H, W = x.shape
    K = kernel_size
    pad = 3 if K == 7 else 1
    HW = H * W
    out_dtype = x.dtype

    # Lane-dense layout (free reshape for contiguous NCHW).
    x_flat = x.reshape(N, C, HW)
    wflat = weight.reshape(-1).astype(jnp.float32)           # (2*K*K,)

    # Validity masks for the rolled-plane conv taps (flat index p = i*W + j):
    #   rows [0:K)  : column masks per dj  (function of j = p % W)
    #   rows [K:2K) : row masks per di     (function of i = p // W)
    j = jnp.arange(W)
    i = jnp.arange(H)
    rows = []
    for d in range(K):
        jc = j + (d - pad)
        rows.append(jnp.tile(((jc >= 0) & (jc < W)).astype(jnp.float32), H))
    for d in range(K):
        ic = i + (d - pad)
        rows.append(jnp.repeat(((ic >= 0) & (ic < H)).astype(jnp.float32), W))
    mask_arr = jnp.stack(rows)                                # (2K, HW)

    in_itemsize = jnp.dtype(x.dtype).itemsize
    out_itemsize = jnp.dtype(out_dtype).itemsize
    vmem_limit, target = _vmem_info()
    Nb, Ct = _pick_tiles(N, C, HW, in_itemsize, out_itemsize, K, vmem_limit, target)
    nb, nc = N // Nb, C // Ct

    kernel = functools.partial(_spatial_attention_kernel,
                               H=H, W=W, K=K, C=C, pad=pad)

    out_flat = pl.pallas_call(
        kernel,
        out_shape=jax.ShapeDtypeStruct((N, 1, HW), out_dtype),
        grid=(nb, nc),
        in_specs=[
            pl.BlockSpec((Nb, Ct, HW), lambda n, c: (n, c, 0)),       # input slab
            pl.BlockSpec(memory_space=pltpu.MemorySpace.SMEM),        # conv weights
            pl.BlockSpec((2 * K, HW), lambda n, c: (0, 0)),           # tap masks
        ],
        out_specs=pl.BlockSpec((Nb, 1, HW), lambda n, c: (n, 0, 0)),
        scratch_shapes=[
            pltpu.VMEM((Nb, HW), jnp.float32),   # running channel sum
            pltpu.VMEM((Nb, HW), jnp.float32),   # running channel max
        ],
        compiler_params=pltpu.CompilerParams(
            dimension_semantics=("parallel", "arbitrary"),
            vmem_limit_bytes=vmem_limit,
        ),
    )(x_flat, wflat, mask_arr)

    return out_flat.reshape(N, 1, H, W)


def spatial_attention_ref(x, weight):
    K = weight.shape[-1]
    pad = 3 if K == 7 else 1
    avg = jnp.mean(x, axis=1, keepdims=True)
    mx = jnp.max(x, axis=1, keepdims=True)
    xc = jnp.concatenate([avg, mx], axis=1)
    y = jax.lax.conv_general_dilated(
        xc.astype(jnp.float32), weight.astype(jnp.float32), window_strides=(1, 1),
        padding=[(pad, pad), (pad, pad)],
        dimension_numbers=("NCHW", "OIHW", "NCHW"))
    return jax.nn.sigmoid(y)


if __name__ == "__main__":
    key = jax.random.PRNGKey(0)
    kx, kw = jax.random.split(key)

    N, C, H, W = 2, 4, 16, 16
    K = 7
    x = jax.random.normal(kx, (N, C, H, W), dtype=jnp.float32)

    # Deterministic Conv2d(2, 1, 7, bias=False) weight init (kaiming-uniform-like).
    fan_in = 2 * K * K
    bound = 1.0 / np.sqrt(fan_in)
    weight = jax.random.uniform(kw, (1, 2, K, K), dtype=jnp.float32,
                                minval=-bound, maxval=bound)

    out = spatial_attention(x, weight, kernel_size=K)
    out = jax.block_until_ready(out)

    ref = spatial_attention_ref(x, weight)
    np.testing.assert_allclose(np.asarray(out, dtype=np.float32), np.asarray(ref),
                               rtol=1e-5, atol=1e-5)

    print("KERNEL_OK")
</pallas_src>

<mosaic_0001>
module attributes {stable_mosaic.version = 11 : i64} {
  func.func @_spatial_attention_kernel(%arg0: i32, %arg1: i32, %arg2: memref<1x4x256xf32, #tpu.memory_space<vmem>>, %arg3: memref<98xf32, #tpu.memory_space<smem>>, %arg4: memref<14x256xf32, #tpu.memory_space<vmem>>, %arg5: memref<1x1x256xf32, #tpu.memory_space<vmem>>, %arg6: memref<1x256xf32, #tpu.memory_space<vmem>>, %arg7: memref<1x256xf32, #tpu.memory_space<vmem>>) attributes {dimension_semantics = [#tpu.dimension_semantics<parallel>, #tpu.dimension_semantics<arbitrary>], iteration_bounds = array<i64: 2, 1>, scalar_prefetch = 0 : i64, scratch_operands = 2 : i64, tpu.core_type = #tpu.core_type<tc>, window_params = [{transform_indices = @transform_0, window_bounds = array<i64: 1, 4, 256>}, {transform_indices = @transform_1, window_bounds = array<i64: 98>}, {pipeline_mode = #tpu.pipeline_mode<synchronous>, transform_indices = @transform_2, window_bounds = array<i64: 14, 256>}, {transform_indices = @transform_3, window_bounds = array<i64: 1, 1, 256>}]} {
    %c0_i32 = arith.constant 0 : i32
    %0 = arith.cmpi eq, %arg1, %c0_i32 : i32
    %1 = arith.extui %0 : i1 to i32
    %c0_i32_0 = arith.constant 0 : i32
    %2 = arith.cmpi ne, %1, %c0_i32_0 : i32
    scf.if %2 {
      %cst_14 = arith.constant 0.000000e+00 : f32
      %15 = vector.broadcast %cst_14 : f32 to vector<1x256xf32>
      %c0_15 = arith.constant 0 : index
      %c0_16 = arith.constant 0 : index
      %16 = vector.load %arg6[%c0_15, %c0_16] : memref<1x256xf32, #tpu.memory_space<vmem>>, vector<1x256xf32>
      tpu.vector_store %arg6[%c0_15, %c0_16], %15 {strides = array<i32>} : memref<1x256xf32, #tpu.memory_space<vmem>>, vector<1x256xf32>,
      %cst_17 = arith.constant 0xFF800000 : f32
      %17 = vector.broadcast %cst_17 : f32 to vector<1x256xf32>
      %c0_18 = arith.constant 0 : index
      %c0_19 = arith.constant 0 : index
      %18 = vector.load %arg7[%c0_18, %c0_19] : memref<1x256xf32, #tpu.memory_space<vmem>>, vector<1x256xf32>
      tpu.vector_store %arg7[%c0_18, %c0_19], %17 {strides = array<i32>} : memref<1x256xf32, #tpu.memory_space<vmem>>, vector<1x256xf32>,
    } else {
    }
    %c0 = arith.constant 0 : index
    %c0_1 = arith.constant 0 : index
    %c0_2 = arith.constant 0 : index
    %3 = vector.load %arg2[%c0, %c0_1, %c0_2] : memref<1x4x256xf32, #tpu.memory_space<vmem>>, vector<1x4x256xf32>
    %c0_3 = arith.constant 0 : index
    %c0_4 = arith.constant 0 : index
    %4 = vector.load %arg6[%c0_3, %c0_4] : memref<1x256xf32, #tpu.memory_space<vmem>>, vector<1x256xf32>
    %cst = arith.constant dense<0.000000e+00> : vector<1x256xf32>
    %5 = vector.multi_reduction <add>, %3, %cst [1] : vector<1x4x256xf32> to vector<1x256xf32>
    %6 = arith.addf %4, %5 : vector<1x256xf32>
    %c0_5 = arith.constant 0 : index
    %c0_6 = arith.constant 0 : index
    %7 = vector.load %arg6[%c0_5, %c0_6] : memref<1x256xf32, #tpu.memory_space<vmem>>, vector<1x256xf32>
    tpu.vector_store %arg6[%c0_5, %c0_6], %6 {strides = array<i32>} : memref<1x256xf32, #tpu.memory_space<vmem>>, vector<1x256xf32>,
    %c0_7 = arith.constant 0 : index
    %c0_8 = arith.constant 0 : index
    %8 = vector.load %arg7[%c0_7, %c0_8] : memref<1x256xf32, #tpu.memory_space<vmem>>, vector<1x256xf32>
    %cst_9 = arith.constant dense<0xFF800000> : vector<1x256xf32>
    %9 = vector.multi_reduction <maximumf>, %3, %cst_9 [1] : vector<1x4x256xf32> to vector<1x256xf32>
    %10 = arith.maximumf %8, %9 : vector<1x256xf32>
    %c0_10 = arith.constant 0 : index
    %c0_11 = arith.constant 0 : index
    %11 = vector.load %arg7[%c0_10, %c0_11] : memref<1x256xf32, #tpu.memory_space<vmem>>, vector<1x256xf32>
    tpu.vector_store %arg7[%c0_10, %c0_11], %10 {strides = array<i32>} : memref<1x256xf32, #tpu.memory_space<vmem>>, vector<1x256xf32>,
    %c0_i32_12 = arith.constant 0 : i32
    %12 = arith.cmpi eq, %arg1, %c0_i32_12 : i32
    %13 = arith.extui %12 : i1 to i32
    %c0_i32_13 = arith.constant 0 : i32
    %14 = arith.cmpi ne, %13, %c0_i32_13 : i32
    scf.if %14 {
      %c0_14 = arith.constant 0 : index
      %c0_15 = arith.constant 0 : index
      %15 = vector.load %arg6[%c0_14, %c0_15] : memref<1x256xf32, #tpu.memory_space<vmem>>, vector<1x256xf32>
      %cst_16 = arith.constant 2.500000e-01 : f32
      %16 = vector.broadcast %cst_16 : f32 to vector<1x256xf32>
      %17 = arith.mulf %15, %16 : vector<1x256xf32>
      %c0_17 = arith.constant 0 : index
      %c0_18 = arith.constant 0 : index
      %18 = vector.load %arg7[%c0_17, %c0_18] : memref<1x256xf32, #tpu.memory_space<vmem>>, vector<1x256xf32>
      %c0_19 = arith.constant 0 : index
      %c0_20 = arith.constant 0 : index
      %19 = vector.load %arg4[%c0_19, %c0_20] : memref<14x256xf32, #tpu.memory_space<vmem>>, vector<14x256xf32>
      %20 = vector.extract_strided_slice %19 {offsets = [0, 0], sizes = [1, 256], strides = [1, 1]} : vector<14x256xf32> to vector<1x256xf32>
      %21 = vector.extract_strided_slice %17 {offsets = [0, 253], sizes = [1, 3], strides = [1, 1]} : vector<1x256xf32> to vector<1x3xf32>
      %22 = vector.extract_strided_slice %17 {offsets = [0, 0], sizes = [1, 253], strides = [1, 1]} : vector<1x256xf32> to vector<1x253xf32>
      %23 = tpu.concatenate %21, %22 in 1 : vector<1x3xf32>, vector<1x253xf32> -> vector<1x256xf32>
      %24 = arith.mulf %23, %20 : vector<1x256xf32>
      %25 = vector.extract_strided_slice %18 {offsets = [0, 253], sizes = [1, 3], strides = [1, 1]} : vector<1x256xf32> to vector<1x3xf32>
      %26 = vector.extract_strided_slice %18 {offsets = [0, 0], sizes = [1, 253], strides = [1, 1]} : vector<1x256xf32> to vector<1x253xf32>
      %27 = tpu.concatenate %25, %26 in 1 : vector<1x3xf32>, vector<1x253xf32> -> vector<1x256xf32>
      %28 = arith.mulf %27, %20 : vector<1x256xf32>
      %29 = vector.extract_strided_slice %19 {offsets = [1, 0], sizes = [1, 256], strides = [1, 1]} : vector<14x256xf32> to vector<1x256xf32>
      %30 = vector.extract_strided_slice %17 {offsets = [0, 254], sizes = [1, 2], strides = [1, 1]} : vector<1x256xf32> to vector<1x2xf32>
      %31 = vector.extract_strided_slice %17 {offsets = [0, 0], sizes = [1, 254], strides = [1, 1]} : vector<1x256xf32> to vector<1x254xf32>
      %32 = tpu.concatenate %30, %31 in 1 : vector<1x2xf32>, vector<1x254xf32> -> vector<1x256xf32>
      %33 = arith.mulf %32, %29 : vector<1x256xf32>
      %34 = vector.extract_strided_slice %18 {offsets = [0, 254], sizes = [1, 2], strides = [1, 1]} : vector<1x256xf32> to vector<1x2xf32>
      %35 = vector.extract_strided_slice %18 {offsets = [0, 0], sizes = [1, 254], strides = [1, 1]} : vector<1x256xf32> to vector<1x254xf32>
      %36 = tpu.concatenate %34, %35 in 1 : vector<1x2xf32>, vector<1x254xf32> -> vector<1x256xf32>
      %37 = arith.mulf %36, %29 : vector<1x256xf32>
      %38 = vector.extract_strided_slice %19 {offsets = [2, 0], sizes = [1, 256], strides = [1, 1]} : vector<14x256xf32> to vector<1x256xf32>
      %39 = vector.extract_strided_slice %17 {offsets = [0, 255], sizes = [1, 1], strides = [1, 1]} : vector<1x256xf32> to vector<1x1xf32>
      %40 = vector.extract_strided_slice %17 {offsets = [0, 0], sizes = [1, 255], strides = [1, 1]} : vector<1x256xf32> to vector<1x255xf32>
      %41 = tpu.concatenate %39, %40 in 1 : vector<1x1xf32>, vector<1x255xf32> -> vector<1x256xf32>
      %42 = arith.mulf %41, %38 : vector<1x256xf32>
      %43 = vector.extract_strided_slice %18 {offsets = [0, 255], sizes = [1, 1], strides = [1, 1]} : vector<1x256xf32> to vector<1x1xf32>
      %44 = vector.extract_strided_slice %18 {offsets = [0, 0], sizes = [1, 255], strides = [1, 1]} : vector<1x256xf32> to vector<1x255xf32>
      %45 = tpu.concatenate %43, %44 in 1 : vector<1x1xf32>, vector<1x255xf32> -> vector<1x256xf32>
      %46 = arith.mulf %45, %38 : vector<1x256xf32>
      %47 = vector.extract_strided_slice %19 {offsets = [3, 0], sizes = [1, 256], strides = [1, 1]} : vector<14x256xf32> to vector<1x256xf32>
      %48 = arith.mulf %17, %47 : vector<1x256xf32>
      %49 = arith.mulf %18, %47 : vector<1x256xf32>
      %50 = vector.extract_strided_slice %19 {offsets = [4, 0], sizes = [1, 256], strides = [1, 1]} : vector<14x256xf32> to vector<1x256xf32>
      %51 = vector.extract_strided_slice %17 {offsets = [0, 1], sizes = [1, 255], strides = [1, 1]} : vector<1x256xf32> to vector<1x255xf32>
      %52 = vector.extract_strided_slice %17 {offsets = [0, 0], sizes = [1, 1], strides = [1, 1]} : vector<1x256xf32> to vector<1x1xf32>
      %53 = tpu.concatenate %51, %52 in 1 : vector<1x255xf32>, vector<1x1xf32> -> vector<1x256xf32>
      %54 = arith.mulf %53, %50 : vector<1x256xf32>
      %55 = vector.extract_strided_slice %18 {offsets = [0, 1], sizes = [1, 255], strides = [1, 1]} : vector<1x256xf32> to vector<1x255xf32>
      %56 = vector.extract_strided_slice %18 {offsets = [0, 0], sizes = [1, 1], strides = [1, 1]} : vector<1x256xf32> to vector<1x1xf32>
      %57 = tpu.concatenate %55, %56 in 1 : vector<1x255xf32>, vector<1x1xf32> -> vector<1x256xf32>
      %58 = arith.mulf %57, %50 : vector<1x256xf32>
      %59 = vector.extract_strided_slice %19 {offsets = [5, 0], sizes = [1, 256], strides = [1, 1]} : vector<14x256xf32> to vector<1x256xf32>
      %60 = vector.extract_strided_slice %17 {offsets = [0, 2], sizes = [1, 254], strides = [1, 1]} : vector<1x256xf32> to vector<1x254xf32>
      %61 = vector.extract_strided_slice %17 {offsets = [0, 0], sizes = [1, 2], strides = [1, 1]} : vector<1x256xf32> to vector<1x2xf32>
      %62 = tpu.concatenate %60, %61 in 1 : vector<1x254xf32>, vector<1x2xf32> -> vector<1x256xf32>
      %63 = arith.mulf %62, %59 : vector<1x256xf32>
      %64 = vector.extract_strided_slice %18 {offsets = [0, 2], sizes = [1, 254], strides = [1, 1]} : vector<1x256xf32> to vector<1x254xf32>
      %65 = vector.extract_strided_slice %18 {offsets = [0, 0], sizes = [1, 2], strides = [1, 1]} : vector<1x256xf32> to vector<1x2xf32>
      %66 = tpu.concatenate %64, %65 in 1 : vector<1x254xf32>, vector<1x2xf32> -> vector<1x256xf32>
      %67 = arith.mulf %66, %59 : vector<1x256xf32>
      %68 = vector.extract_strided_slice %19 {offsets = [6, 0], sizes = [1, 256], strides = [1, 1]} : vector<14x256xf32> to vector<1x256xf32>
      %69 = vector.extract_strided_slice %17 {offsets = [0, 3], sizes = [1, 253], strides = [1, 1]} : vector<1x256xf32> to vector<1x253xf32>
      %70 = vector.extract_strided_slice %17 {offsets = [0, 0], sizes = [1, 3], strides = [1, 1]} : vector<1x256xf32> to vector<1x3xf32>
      %71 = tpu.concatenate %69, %70 in 1 : vector<1x253xf32>, vector<1x3xf32> -> vector<1x256xf32>
      %72 = arith.mulf %71, %68 : vector<1x256xf32>
      %73 = vector.extract_strided_slice %18 {offsets = [0, 3], sizes = [1, 253], strides = [1, 1]} : vector<1x256xf32> to vector<1x253xf32>
      %74 = vector.extract_strided_slice %18 {offsets = [0, 0], sizes = [1, 3], strides = [1, 1]} : vector<1x256xf32> to vector<1x3xf32>
      %75 = tpu.concatenate %73, %74 in 1 : vector<1x253xf32>, vector<1x3xf32> -> vector<1x256xf32>
      %76 = arith.mulf %75, %68 : vector<1x256xf32>
      %cst_21 = arith.constant 0.000000e+00 : f32
      %77 = vector.broadcast %cst_21 : f32 to vector<1x256xf32>
      %cst_22 = arith.constant 0.000000e+00 : f32
      %78 = vector.broadcast %cst_22 : f32 to vector<1x256xf32>
      %c0_23 = arith.constant 0 : index
      %79 = memref.load %arg3[%c0_23] : memref<98xf32, #tpu.memory_space<smem>>
      %80 = vector.broadcast %79 : f32 to vector<1x256xf32>
      %81 = arith.mulf %80, %24 : vector<1x256xf32>
      %82 = arith.addf %78, %81 : vector<1x256xf32>
      %c49 = arith.constant 49 : index
      %83 = memref.load %arg3[%c49] : memref<98xf32, #tpu.memory_space<smem>>
      %84 = vector.broadcast %83 : f32 to vector<1x256xf32>
      %85 = arith.mulf %84, %28 : vector<1x256xf32>
      %86 = arith.addf %82, %85 : vector<1x256xf32>
      %c1 = arith.constant 1 : index
      %87 = memref.load %arg3[%c1] : memref<98xf32, #tpu.memory_space<smem>>
      %88 = vector.broadcast %87 : f32 to vector<1x256xf32>
      %89 = arith.mulf %88, %33 : vector<1x256xf32>
      %90 = arith.addf %86, %89 : vector<1x256xf32>
      %c50 = arith.constant 50 : index
      %91 = memref.load %arg3[%c50] : memref<98xf32, #tpu.memory_space<smem>>
      %92 = vector.broadcast %91 : f32 to vector<1x256xf32>
      %93 = arith.mulf %92, %37 : vector<1x256xf32>
      %94 = arith.addf %90, %93 : vector<1x256xf32>
      %c2 = arith.constant 2 : index
      %95 = memref.load %arg3[%c2] : memref<98xf32, #tpu.memory_space<smem>>
      %96 = vector.broadcast %95 : f32 to vector<1x256xf32>
      %97 = arith.mulf %96, %42 : vector<1x256xf32>
      %98 = arith.addf %94, %97 : vector<1x256xf32>
      %c51 = arith.constant 51 : index
      %99 = memref.load %arg3[%c51] : memref<98xf32, #tpu.memory_space<smem>>
      %100 = vector.broadcast %99 : f32 to vector<1x256xf32>
      %101 = arith.mulf %100, %46 : vector<1x256xf32>
      %102 = arith.addf %98, %101 : vector<1x256xf32>
      %c3 = arith.constant 3 : index
      %103 = memref.load %arg3[%c3] : memref<98xf32, #tpu.memory_space<smem>>
      %104 = vector.broadcast %103 : f32 to vector<1x256xf32>
      %105 = arith.mulf %104, %48 : vector<1x256xf32>
      %106 = arith.addf %102, %105 : vector<1x256xf32>
      %c52 = arith.constant 52 : index
      %107 = memref.load %arg3[%c52] : memref<98xf32, #tpu.memory_space<smem>>
      %108 = vector.broadcast %107 : f32 to vector<1x256xf32>
      %109 = arith.mulf %108, %49 : vector<1x256xf32>
      %110 = arith.addf %106, %109 : vector<1x256xf32>
      %c4 = arith.constant 4 : index
      %111 = memref.load %arg3[%c4] : memref<98xf32, #tpu.memory_space<smem>>
      %112 = vector.broadcast %111 : f32 to vector<1x256xf32>
      %113 = arith.mulf %112, %54 : vector<1x256xf32>
      %114 = arith.addf %110, %113 : vector<1x256xf32>
      %c53 = arith.constant 53 : index
      %115 = memref.load %arg3[%c53] : memref<98xf32, #tpu.memory_space<smem>>
      %116 = vector.broadcast %115 : f32 to vector<1x256xf32>
      %117 = arith.mulf %116, %58 : vector<1x256xf32>
      %118 = arith.addf %114, %117 : vector<1x256xf32>
      %c5 = arith.constant 5 : index
      %119 = memref.load %arg3[%c5] : memref<98xf32, #tpu.memory_space<smem>>
      %120 = vector.broadcast %119 : f32 to vector<1x256xf32>
      %121 = arith.mulf %120, %63 : vector<1x256xf32>
      %122 = arith.addf %118, %121 : vector<1x256xf32>
      %c54 = arith.constant 54 : index
      %123 = memref.load %arg3[%c54] : memref<98xf32, #tpu.memory_space<smem>>
      %124 = vector.broadcast %123 : f32 to vector<1x256xf32>
      %125 = arith.mulf %124, %67 : vector<1x256xf32>
      %126 = arith.addf %122, %125 : vector<1x256xf32>
      %c6 = arith.constant 6 : index
      %127 = memref.load %arg3[%c6] : memref<98xf32, #tpu.memory_space<smem>>
      %128 = vector.broadcast %127 : f32 to vector<1x256xf32>
      %129 = arith.mulf %128, %72 : vector<1x256xf32>
      %130 = arith.addf %126, %129 : vector<1x256xf32>
      %c55 = arith.constant 55 : index
      %131 = memref.load %arg3[%c55] : memref<98xf32, #tpu.memory_space<smem>>
      %132 = vector.broadcast %131 : f32 to vector<1x256xf32>
      %133 = arith.mulf %132, %76 : vector<1x256xf32>
      %134 = arith.addf %130, %133 : vector<1x256xf32>
      %135 = vector.extract_strided_slice %134 {offsets = [0, 208], sizes = [1, 48], strides = [1, 1]} : vector<1x256xf32> to vector<1x48xf32>
      %136 = vector.extract_strided_slice %134 {offsets = [0, 0], sizes = [1, 208], strides = [1, 1]} : vector<1x256xf32> to vector<1x208xf32>
      %137 = tpu.concatenate %135, %136 in 1 : vector<1x48xf32>, vector<1x208xf32> -> vector<1x256xf32>
      %138 = vector.extract_strided_slice %19 {offsets = [7, 0], sizes = [1, 256], strides = [1, 1]} : vector<14x256xf32> to vector<1x256xf32>
      %139 = arith.mulf %138, %137 : vector<1x256xf32>
      %140 = arith.addf %77, %139 : vector<1x256xf32>
      %cst_24 = arith.constant 0.000000e+00 : f32
      %141 = vector.broadcast %cst_24 : f32 to vector<1x256xf32>
      %c7 = arith.constant 7 : index
      %142 = memref.load %arg3[%c7] : memref<98xf32, #tpu.memory_space<smem>>
      %143 = vector.broadcast %142 : f32 to vector<1x256xf32>
      %144 = arith.mulf %143, %24 : vector<1x256xf32>
      %145 = arith.addf %141, %144 : vector<1x256xf32>
      %c56 = arith.constant 56 : index
      %146 = memref.load %arg3[%c56] : memref<98xf32, #tpu.memory_space<smem>>
      %147 = vector.broadcast %146 : f32 to vector<1x256xf32>
      %148 = arith.mulf %147, %28 : vector<1x256xf32>
      %149 = arith.addf %145, %148 : vector<1x256xf32>
      %c8 = arith.constant 8 : index
      %150 = memref.load %arg3[%c8] : memref<98xf32, #tpu.memory_space<smem>>
      %151 = vector.broadcast %150 : f32 to vector<1x256xf32>
      %152 = arith.mulf %151, %33 : vector<1x256xf32>
      %153 = arith.addf %149, %152 : vector<1x256xf32>
      %c57 = arith.constant 57 : index
      %154 = memref.load %arg3[%c57] : memref<98xf32, #tpu.memory_space<smem>>
      %155 = vector.broadcast %154 : f32 to vector<1x256xf32>
      %156 = arith.mulf %155, %37 : vector<1x256xf32>
      %157 = arith.addf %153, %156 : vector<1x256xf32>
      %c9 = arith.constant 9 : index
      %158 = memref.load %arg3[%c9] : memref<98xf32, #tpu.memory_space<smem>>
      %159 = vector.broadcast %158 : f32 to vector<1x256xf32>
      %160 = arith.mulf %159, %42 : vector<1x256xf32>
      %161 = arith.addf %157, %160 : vector<1x256xf32>
      %c58 = arith.constant 58 : index
      %162 = memref.load %arg3[%c58] : memref<98xf32, #tpu.memory_space<smem>>
      %163 = vector.broadcast %162 : f32 to vector<1x256xf32>
      %164 = arith.mulf %163, %46 : vector<1x256xf32>
      %165 = arith.addf %161, %164 : vector<1x256xf32>
      %c10 = arith.constant 10 : index
      %166 = memref.load %arg3[%c10] : memref<98xf32, #tpu.memory_space<smem>>
      %167 = vector.broadcast %166 : f32 to vector<1x256xf32>
      %168 = arith.mulf %167, %48 : vector<1x256xf32>
      %169 = arith.addf %165, %168 : vector<1x256xf32>
      %c59 = arith.constant 59 : index
      %170 = memref.load %arg3[%c59] : memref<98xf32, #tpu.memory_space<smem>>
      %171 = vector.broadcast %170 : f32 to vector<1x256xf32>
      %172 = arith.mulf %171, %49 : vector<1x256xf32>
      %173 = arith.addf %169, %172 : vector<1x256xf32>
      %c11 = arith.constant 11 : index
      %174 = memref.load %arg3[%c11] : memref<98xf32, #tpu.memory_space<smem>>
      %175 = vector.broadcast %174 : f32 to vector<1x256xf32>
      %176 = arith.mulf %175, %54 : vector<1x256xf32>
      %177 = arith.addf %173, %176 : vector<1x256xf32>
      %c60 = arith.constant 60 : index
      %178 = memref.load %arg3[%c60] : memref<98xf32, #tpu.memory_space<smem>>
      %179 = vector.broadcast %178 : f32 to vector<1x256xf32>
      %180 = arith.mulf %179, %58 : vector<1x256xf32>
      %181 = arith.addf %177, %180 : vector<1x256xf32>
      %c12 = arith.constant 12 : index
      %182 = memref.load %arg3[%c12] : memref<98xf32, #tpu.memory_space<smem>>
      %183 = vector.broadcast %182 : f32 to vector<1x256xf32>
      %184 = arith.mulf %183, %63 : vector<1x256xf32>
      %185 = arith.addf %181, %184 : vector<1x256xf32>
      %c61 = arith.constant 61 : index
      %186 = memref.load %arg3[%c61] : memref<98xf32, #tpu.memory_space<smem>>
      %187 = vector.broadcast %186 : f32 to vector<1x256xf32>
      %188 = arith.mulf %187, %67 : vector<1x256xf32>
      %189 = arith.addf %185, %188 : vector<1x256xf32>
      %c13 = arith.constant 13 : index
      %190 = memref.load %arg3[%c13] : memref<98xf32, #tpu.memory_space<smem>>
      %191 = vector.broadcast %190 : f32 to vector<1x256xf32>
      %192 = arith.mulf %191, %72 : vector<1x256xf32>
      %193 = arith.addf %189, %192 : vector<1x256xf32>
      %c62 = arith.constant 62 : index
      %194 = memref.load %arg3[%c62] : memref<98xf32, #tpu.memory_space<smem>>
      %195 = vector.broadcast %194 : f32 to vector<1x256xf32>
      %196 = arith.mulf %195, %76 : vector<1x256xf32>
      %197 = arith.addf %193, %196 : vector<1x256xf32>
      %198 = vector.extract_strided_slice %197 {offsets = [0, 224], sizes = [1, 32], strides = [1, 1]} : vector<1x256xf32> to vector<1x32xf32>
      %199 = vector.extract_strided_slice %197 {offsets = [0, 0], sizes = [1, 224], strides = [1, 1]} : vector<1x256xf32> to vector<1x224xf32>
      %200 = tpu.concatenate %198, %199 in 1 : vector<1x32xf32>, vector<1x224xf32> -> vector<1x256xf32>
      %201 = vector.extract_strided_slice %19 {offsets = [8, 0], sizes = [1, 256], strides = [1, 1]} : vector<14x256xf32> to vector<1x256xf32>
      %202 = arith.mulf %201, %200 : vector<1x256xf32>
      %203 = arith.addf %140, %202 : vector<1x256xf32>
      %cst_25 = arith.constant 0.000000e+00 : f32
      %204 = vector.broadcast %cst_25 : f32 to vector<1x256xf32>
      %c14 = arith.constant 14 : index
      %205 = memref.load %arg3[%c14] : memref<98xf32, #tpu.memory_space<smem>>
      %206 = vector.broadcast %205 : f32 to vector<1x256xf32>
      %207 = arith.mulf %206, %24 : vector<1x256xf32>
      %208 = arith.addf %204, %207 : vector<1x256xf32>
      %c63 = arith.constant 63 : index
      %209 = memref.load %arg3[%c63] : memref<98xf32, #tpu.memory_space<smem>>
      %210 = vector.broadcast %209 : f32 to vector<1x256xf32>
      %211 = arith.mulf %210, %28 : vector<1x256xf32>
      %212 = arith.addf %208, %211 : vector<1x256xf32>
      %c15 = arith.constant 15 : index
      %213 = memref.load %arg3[%c15] : memref<98xf32, #tpu.memory_space<smem>>
      %214 = vector.broadcast %213 : f32 to vector<1x256xf32>
      %215 = arith.mulf %214, %33 : vector<1x256xf32>
      %216 = arith.addf %212, %215 : vector<1x256xf32>
      %c64 = arith.constant 64 : index
      %217 = memref.load %arg3[%c64] : memref<98xf32, #tpu.memory_space<smem>>
      %218 = vector.broadcast %217 : f32 to vector<1x256xf32>
      %219 = arith.mulf %218, %37 : vector<1x256xf32>
      %220 = arith.addf %216, %219 : vector<1x256xf32>
      %c16 = arith.constant 16 : index
      %221 = memref.load %arg3[%c16] : memref<98xf32, #tpu.memory_space<smem>>
      %222 = vector.broadcast %221 : f32 to vector<1x256xf32>
      %223 = arith.mulf %222, %42 : vector<1x256xf32>
      %224 = arith.addf %220, %223 : vector<1x256xf32>
      %c65 = arith.constant 65 : index
      %225 = memref.load %arg3[%c65] : memref<98xf32, #tpu.memory_space<smem>>
      %226 = vector.broadcast %225 : f32 to vector<1x256xf32>
      %227 = arith.mulf %226, %46 : vector<1x256xf32>
      %228 = arith.addf %224, %227 : vector<1x256xf32>
      %c17 = arith.constant 17 : index
      %229 = memref.load %arg3[%c17] : memref<98xf32, #tpu.memory_space<smem>>
      %230 = vector.broadcast %229 : f32 to vector<1x256xf32>
      %231 = arith.mulf %230, %48 : vector<1x256xf32>
      %232 = arith.addf %228, %231 : vector<1x256xf32>
      %c66 = arith.constant 66 : index
      %233 = memref.load %arg3[%c66] : memref<98xf32, #tpu.memory_space<smem>>
      %234 = vector.broadcast %233 : f32 to vector<1x256xf32>
      %235 = arith.mulf %234, %49 : vector<1x256xf32>
      %236 = arith.addf %232, %235 : vector<1x256xf32>
      %c18 = arith.constant 18 : index
      %237 = memref.load %arg3[%c18] : memref<98xf32, #tpu.memory_space<smem>>
      %238 = vector.broadcast %237 : f32 to vector<1x256xf32>
      %239 = arith.mulf %238, %54 : vector<1x256xf32>
      %240 = arith.addf %236, %239 : vector<1x256xf32>
      %c67 = arith.constant 67 : index
      %241 = memref.load %arg3[%c67] : memref<98xf32, #tpu.memory_space<smem>>
      %242 = vector.broadcast %241 : f32 to vector<1x256xf32>
      %243 = arith.mulf %242, %58 : vector<1x256xf32>
      %244 = arith.addf %240, %243 : vector<1x256xf32>
      %c19 = arith.constant 19 : index
      %245 = memref.load %arg3[%c19] : memref<98xf32, #tpu.memory_space<smem>>
      %246 = vector.broadcast %245 : f32 to vector<1x256xf32>
      %247 = arith.mulf %246, %63 : vector<1x256xf32>
      %248 = arith.addf %244, %247 : vector<1x256xf32>
      %c68 = arith.constant 68 : index
      %249 = memref.load %arg3[%c68] : memref<98xf32, #tpu.memory_space<smem>>
      %250 = vector.broadcast %249 : f32 to vector<1x256xf32>
      %251 = arith.mulf %250, %67 : vector<1x256xf32>
      %252 = arith.addf %248, %251 : vector<1x256xf32>
      %c20 = arith.constant 20 : index
      %253 = memref.load %arg3[%c20] : memref<98xf32, #tpu.memory_space<smem>>
      %254 = vector.broadcast %253 : f32 to vector<1x256xf32>
      %255 = arith.mulf %254, %72 : vector<1x256xf32>
      %256 = arith.addf %252, %255 : vector<1x256xf32>
      %c69 = arith.constant 69 : index
      %257 = memref.load %arg3[%c69] : memref<98xf32, #tpu.memory_space<smem>>
      %258 = vector.broadcast %257 : f32 to vector<1x256xf32>
      %259 = arith.mulf %258, %76 : vector<1x256xf32>
      %260 = arith.addf %256, %259 : vector<1x256xf32>
      %261 = vector.extract_strided_slice %260 {offsets = [0, 240], sizes = [1, 16], strides = [1, 1]} : vector<1x256xf32> to vector<1x16xf32>
      %262 = vector.extract_strided_slice %260 {offsets = [0, 0], sizes = [1, 240], strides = [1, 1]} : vector<1x256xf32> to vector<1x240xf32>
      %263 = tpu.concatenate %261, %262 in 1 : vector<1x16xf32>, vector<1x240xf32> -> vector<1x256xf32>
      %264 = vector.extract_strided_slice %19 {offsets = [9, 0], sizes = [1, 256], strides = [1, 1]} : vector<14x256xf32> to vector<1x256xf32>
      %265 = arith.mulf %264, %263 : vector<1x256xf32>
      %266 = arith.addf %203, %265 : vector<1x256xf32>
      %cst_26 = arith.constant 0.000000e+00 : f32
      %267 = vector.broadcast %cst_26 : f32 to vector<1x256xf32>
      %c21 = arith.constant 21 : index
      %268 = memref.load %arg3[%c21] : memref<98xf32, #tpu.memory_space<smem>>
      %269 = vector.broadcast %268 : f32 to vector<1x256xf32>
      %270 = arith.mulf %269, %24 : vector<1x256xf32>
      %271 = arith.addf %267, %270 : vector<1x256xf32>
      %c70 = arith.constant 70 : index
      %272 = memref.load %arg3[%c70] : memref<98xf32, #tpu.memory_space<smem>>
      %273 = vector.broadcast %272 : f32 to vector<1x256xf32>
      %274 = arith.mulf %273, %28 : vector<1x256xf32>
      %275 = arith.addf %271, %274 : vector<1x256xf32>
      %c22 = arith.constant 22 : index
      %276 = memref.load %arg3[%c22] : memref<98xf32, #tpu.memory_space<smem>>
      %277 = vector.broadcast %276 : f32 to vector<1x256xf32>
      %278 = arith.mulf %277, %33 : vector<1x256xf32>
      %279 = arith.addf %275, %278 : vector<1x256xf32>
      %c71 = arith.constant 71 : index
      %280 = memref.load %arg3[%c71] : memref<98xf32, #tpu.memory_space<smem>>
      %281 = vector.broadcast %280 : f32 to vector<1x256xf32>
      %282 = arith.mulf %281, %37 : vector<1x256xf32>
      %283 = arith.addf %279, %282 : vector<1x256xf32>
      %c23 = arith.constant 23 : index
      %284 = memref.load %arg3[%c23] : memref<98xf32, #tpu.memory_space<smem>>
      %285 = vector.broadcast %284 : f32 to vector<1x256xf32>
      %286 = arith.mulf %285, %42 : vector<1x256xf32>
      %287 = arith.addf %283, %286 : vector<1x256xf32>
      %c72 = arith.constant 72 : index
      %288 = memref.load %arg3[%c72] : memref<98xf32, #tpu.memory_space<smem>>
      %289 = vector.broadcast %288 : f32 to vector<1x256xf32>
      %290 = arith.mulf %289, %46 : vector<1x256xf32>
      %291 = arith.addf %287, %290 : vector<1x256xf32>
      %c24 = arith.constant 24 : index
      %292 = memref.load %arg3[%c24] : memref<98xf32, #tpu.memory_space<smem>>
      %293 = vector.broadcast %292 : f32 to vector<1x256xf32>
      %294 = arith.mulf %293, %48 : vector<1x256xf32>
      %295 = arith.addf %291, %294 : vector<1x256xf32>
      %c73 = arith.constant 73 : index
      %296 = memref.load %arg3[%c73] : memref<98xf32, #tpu.memory_space<smem>>
      %297 = vector.broadcast %296 : f32 to vector<1x256xf32>
      %298 = arith.mulf %297, %49 : vector<1x256xf32>
      %299 = arith.addf %295, %298 : vector<1x256xf32>
      %c25 = arith.constant 25 : index
      %300 = memref.load %arg3[%c25] : memref<98xf32, #tpu.memory_space<smem>>
      %301 = vector.broadcast %300 : f32 to vector<1x256xf32>
      %302 = arith.mulf %301, %54 : vector<1x256xf32>
      %303 = arith.addf %299, %302 : vector<1x256xf32>
      %c74 = arith.constant 74 : index
      %304 = memref.load %arg3[%c74] : memref<98xf32, #tpu.memory_space<smem>>
      %305 = vector.broadcast %304 : f32 to vector<1x256xf32>
      %306 = arith.mulf %305, %58 : vector<1x256xf32>
      %307 = arith.addf %303, %306 : vector<1x256xf32>
      %c26 = arith.constant 26 : index
      %308 = memref.load %arg3[%c26] : memref<98xf32, #tpu.memory_space<smem>>
      %309 = vector.broadcast %308 : f32 to vector<1x256xf32>
      %310 = arith.mulf %309, %63 : vector<1x256xf32>
      %311 = arith.addf %307, %310 : vector<1x256xf32>
      %c75 = arith.constant 75 : index
      %312 = memref.load %arg3[%c75] : memref<98xf32, #tpu.memory_space<smem>>
      %313 = vector.broadcast %312 : f32 to vector<1x256xf32>
      %314 = arith.mulf %313, %67 : vector<1x256xf32>
      %315 = arith.addf %311, %314 : vector<1x256xf32>
      %c27 = arith.constant 27 : index
      %316 = memref.load %arg3[%c27] : memref<98xf32, #tpu.memory_space<smem>>
      %317 = vector.broadcast %316 : f32 to vector<1x256xf32>
      %318 = arith.mulf %317, %72 : vector<1x256xf32>
      %319 = arith.addf %315, %318 : vector<1x256xf32>
      %c76 = arith.constant 76 : index
      %320 = memref.load %arg3[%c76] : memref<98xf32, #tpu.memory_space<smem>>
      %321 = vector.broadcast %320 : f32 to vector<1x256xf32>
      %322 = arith.mulf %321, %76 : vector<1x256xf32>
      %323 = arith.addf %319, %322 : vector<1x256xf32>
      %324 = vector.extract_strided_slice %19 {offsets = [10, 0], sizes = [1, 256], strides = [1, 1]} : vector<14x256xf32> to vector<1x256xf32>
      %325 = arith.mulf %324, %323 : vector<1x256xf32>
      %326 = arith.addf %266, %325 : vector<1x256xf32>
      %cst_27 = arith.constant 0.000000e+00 : f32
      %327 = vector.broadcast %cst_27 : f32 to vector<1x256xf32>
      %c28 = arith.constant 28 : index
      %328 = memref.load %arg3[%c28] : memref<98xf32, #tpu.memory_space<smem>>
      %329 = vector.broadcast %328 : f32 to vector<1x256xf32>
      %330 = arith.mulf %329, %24 : vector<1x256xf32>
      %331 = arith.addf %327, %330 : vector<1x256xf32>
      %c77 = arith.constant 77 : index
      %332 = memref.load %arg3[%c77] : memref<98xf32, #tpu.memory_space<smem>>
      %333 = vector.broadcast %332 : f32 to vector<1x256xf32>
      %334 = arith.mulf %333, %28 : vector<1x256xf32>
      %335 = arith.addf %331, %334 : vector<1x256xf32>
      %c29 = arith.constant 29 : index
      %336 = memref.load %arg3[%c29] : memref<98xf32, #tpu.memory_space<smem>>
      %337 = vector.broadcast %336 : f32 to vector<1x256xf32>
      %338 = arith.mulf %337, %33 : vector<1x256xf32>
      %339 = arith.addf %335, %338 : vector<1x256xf32>
      %c78 = arith.constant 78 : index
      %340 = memref.load %arg3[%c78] : memref<98xf32, #tpu.memory_space<smem>>
      %341 = vector.broadcast %340 : f32 to vector<1x256xf32>
      %342 = arith.mulf %341, %37 : vector<1x256xf32>
      %343 = arith.addf %339, %342 : vector<1x256xf32>
      %c30 = arith.constant 30 : index
      %344 = memref.load %arg3[%c30] : memref<98xf32, #tpu.memory_space<smem>>
      %345 = vector.broadcast %344 : f32 to vector<1x256xf32>
      %346 = arith.mulf %345, %42 : vector<1x256xf32>
      %347 = arith.addf %343, %346 : vector<1x256xf32>
      %c79 = arith.constant 79 : index
      %348 = memref.load %arg3[%c79] : memref<98xf32, #tpu.memory_space<smem>>
      %349 = vector.broadcast %348 : f32 to vector<1x256xf32>
      %350 = arith.mulf %349, %46 : vector<1x256xf32>
      %351 = arith.addf %347, %350 : vector<1x256xf32>
      %c31 = arith.constant 31 : index
      %352 = memref.load %arg3[%c31] : memref<98xf32, #tpu.memory_space<smem>>
      %353 = vector.broadcast %352 : f32 to vector<1x256xf32>
      %354 = arith.mulf %353, %48 : vector<1x256xf32>
      %355 = arith.addf %351, %354 : vector<1x256xf32>
      %c80 = arith.constant 80 : index
      %356 = memref.load %arg3[%c80] : memref<98xf32, #tpu.memory_space<smem>>
      %357 = vector.broadcast %356 : f32 to vector<1x256xf32>
      %358 = arith.mulf %357, %49 : vector<1x256xf32>
      %359 = arith.addf %355, %358 : vector<1x256xf32>
      %c32 = arith.constant 32 : index
      %360 = memref.load %arg3[%c32] : memref<98xf32, #tpu.memory_space<smem>>
      %361 = vector.broadcast %360 : f32 to vector<1x256xf32>
      %362 = arith.mulf %361, %54 : vector<1x256xf32>
      %363 = arith.addf %359, %362 : vector<1x256xf32>
      %c81 = arith.constant 81 : index
      %364 = memref.load %arg3[%c81] : memref<98xf32, #tpu.memory_space<smem>>
      %365 = vector.broadcast %364 : f32 to vector<1x256xf32>
      %366 = arith.mulf %365, %58 : vector<1x256xf32>
      %367 = arith.addf %363, %366 : vector<1x256xf32>
      %c33 = arith.constant 33 : index
      %368 = memref.load %arg3[%c33] : memref<98xf32, #tpu.memory_space<smem>>
      %369 = vector.broadcast %368 : f32 to vector<1x256xf32>
      %370 = arith.mulf %369, %63 : vector<1x256xf32>
      %371 = arith.addf %367, %370 : vector<1x256xf32>
      %c82 = arith.constant 82 : index
      %372 = memref.load %arg3[%c82] : memref<98xf32, #tpu.memory_space<smem>>
      %373 = vector.broadcast %372 : f32 to vector<1x256xf32>
      %374 = arith.mulf %373, %67 : vector<1x256xf32>
      %375 = arith.addf %371, %374 : vector<1x256xf32>
      %c34 = arith.constant 34 : index
      %376 = memref.load %arg3[%c34] : memref<98xf32, #tpu.memory_space<smem>>
      %377 = vector.broadcast %376 : f32 to vector<1x256xf32>
      %378 = arith.mulf %377, %72 : vector<1x256xf32>
      %379 = arith.addf %375, %378 : vector<1x256xf32>
      %c83 = arith.constant 83 : index
      %380 = memref.load %arg3[%c83] : memref<98xf32, #tpu.memory_space<smem>>
      %381 = vector.broadcast %380 : f32 to vector<1x256xf32>
      %382 = arith.mulf %381, %76 : vector<1x256xf32>
      %383 = arith.addf %379, %382 : vector<1x256xf32>
      %384 = vector.extract_strided_slice %383 {offsets = [0, 16], sizes = [1, 240], strides = [1, 1]} : vector<1x256xf32> to vector<1x240xf32>
      %385 = vector.extract_strided_slice %383 {offsets = [0, 0], sizes = [1, 16], strides = [1, 1]} : vector<1x256xf32> to vector<1x16xf32>
      %386 = tpu.concatenate %384, %385 in 1 : vector<1x240xf32>, vector<1x16xf32> -> vector<1x256xf32>
      %387 = vector.extract_strided_slice %19 {offsets = [11, 0], sizes = [1, 256], strides = [1, 1]} : vector<14x256xf32> to vector<1x256xf32>
      %388 = arith.mulf %387, %386 : vector<1x256xf32>
      %389 = arith.addf %326, %388 : vector<1x256xf32>
      %cst_28 = arith.constant 0.000000e+00 : f32
      %390 = vector.broadcast %cst_28 : f32 to vector<1x256xf32>
      %c35 = arith.constant 35 : index
      %391 = memref.load %arg3[%c35] : memref<98xf32, #tpu.memory_space<smem>>
      %392 = vector.broadcast %391 : f32 to vector<1x256xf32>
      %393 = arith.mulf %392, %24 : vector<1x256xf32>
      %394 = arith.addf %390, %393 : vector<1x256xf32>
      %c84 = arith.constant 84 : index
      %395 = memref.load %arg3[%c84] : memref<98xf32, #tpu.memory_space<smem>>
      %396 = vector.broadcast %395 : f32 to vector<1x256xf32>
      %397 = arith.mulf %396, %28 : vector<1x256xf32>
      %398 = arith.addf %394, %397 : vector<1x256xf32>
      %c36 = arith.constant 36 : index
      %399 = memref.load %arg3[%c36] : memref<98xf32, #tpu.memory_space<smem>>
      %400 = vector.broadcast %399 : f32 to vector<1x256xf32>
      %401 = arith.mulf %400, %33 : vector<1x256xf32>
      %402 = arith.addf %398, %401 : vector<1x256xf32>
      %c85 = arith.constant 85 : index
      %403 = memref.load %arg3[%c85] : memref<98xf32, #tpu.memory_space<smem>>
      %404 = vector.broadcast %403 : f32 to vector<1x256xf32>
      %405 = arith.mulf %404, %37 : vector<1x256xf32>
      %406 = arith.addf %402, %405 : vector<1x256xf32>
      %c37 = arith.constant 37 : index
      %407 = memref.load %arg3[%c37] : memref<98xf32, #tpu.memory_space<smem>>
      %408 = vector.broadcast %407 : f32 to vector<1x256xf32>
      %409 = arith.mulf %408, %42 : vector<1x256xf32>
      %410 = arith.addf %406, %409 : vector<1x256xf32>
      %c86 = arith.constant 86 : index
      %411 = memref.load %arg3[%c86] : memref<98xf32, #tpu.memory_space<smem>>
      %412 = vector.broadcast %411 : f32 to vector<1x256xf32>
      %413 = arith.mulf %412, %46 : vector<1x256xf32>
      %414 = arith.addf %410, %413 : vector<1x256xf32>
      %c38 = arith.constant 38 : index
      %415 = memref.load %arg3[%c38] : memref<98xf32, #tpu.memory_space<smem>>
      %416 = vector.broadcast %415 : f32 to vector<1x256xf32>
      %417 = arith.mulf %416, %48 : vector<1x256xf32>
      %418 = arith.addf %414, %417 : vector<1x256xf32>
      %c87 = arith.constant 87 : index
      %419 = memref.load %arg3[%c87] : memref<98xf32, #tpu.memory_space<smem>>
      %420 = vector.broadcast %419 : f32 to vector<1x256xf32>
      %421 = arith.mulf %420, %49 : vector<1x256xf32>
      %422 = arith.addf %418, %421 : vector<1x256xf32>
      %c39 = arith.constant 39 : index
      %423 = memref.load %arg3[%c39] : memref<98xf32, #tpu.memory_space<smem>>
      %424 = vector.broadcast %423 : f32 to vector<1x256xf32>
      %425 = arith.mulf %424, %54 : vector<1x256xf32>
      %426 = arith.addf %422, %425 : vector<1x256xf32>
      %c88 = arith.constant 88 : index
      %427 = memref.load %arg3[%c88] : memref<98xf32, #tpu.memory_space<smem>>
      %428 = vector.broadcast %427 : f32 to vector<1x256xf32>
      %429 = arith.mulf %428, %58 : vector<1x256xf32>
      %430 = arith.addf %426, %429 : vector<1x256xf32>
      %c40 = arith.constant 40 : index
      %431 = memref.load %arg3[%c40] : memref<98xf32, #tpu.memory_space<smem>>
      %432 = vector.broadcast %431 : f32 to vector<1x256xf32>
      %433 = arith.mulf %432, %63 : vector<1x256xf32>
      %434 = arith.addf %430, %433 : vector<1x256xf32>
      %c89 = arith.constant 89 : index
      %435 = memref.load %arg3[%c89] : memref<98xf32, #tpu.memory_space<smem>>
      %436 = vector.broadcast %435 : f32 to vector<1x256xf32>
      %437 = arith.mulf %436, %67 : vector<1x256xf32>
      %438 = arith.addf %434, %437 : vector<1x256xf32>
      %c41 = arith.constant 41 : index
      %439 = memref.load %arg3[%c41] : memref<98xf32, #tpu.memory_space<smem>>
      %440 = vector.broadcast %439 : f32 to vector<1x256xf32>
      %441 = arith.mulf %440, %72 : vector<1x256xf32>
      %442 = arith.addf %438, %441 : vector<1x256xf32>
      %c90 = arith.constant 90 : index
      %443 = memref.load %arg3[%c90] : memref<98xf32, #tpu.memory_space<smem>>
      %444 = vector.broadcast %443 : f32 to vector<1x256xf32>
      %445 = arith.mulf %444, %76 : vector<1x256xf32>
      %446 = arith.addf %442, %445 : vector<1x256xf32>
      %447 = vector.extract_strided_slice %446 {offsets = [0, 32], sizes = [1, 224], strides = [1, 1]} : vector<1x256xf32> to vector<1x224xf32>
      %448 = vector.extract_strided_slice %446 {offsets = [0, 0], sizes = [1, 32], strides = [1, 1]} : vector<1x256xf32> to vector<1x32xf32>
      %449 = tpu.concatenate %447, %448 in 1 : vector<1x224xf32>, vector<1x32xf32> -> vector<1x256xf32>
      %450 = vector.extract_strided_slice %19 {offsets = [12, 0], sizes = [1, 256], strides = [1, 1]} : vector<14x256xf32> to vector<1x256xf32>
      %451 = arith.mulf %450, %449 : vector<1x256xf32>
      %452 = arith.addf %389, %451 : vector<1x256xf32>
      %cst_29 = arith.constant 0.000000e+00 : f32
      %453 = vector.broadcast %cst_29 : f32 to vector<1x256xf32>
      %c42 = arith.constant 42 : index
      %454 = memref.load %arg3[%c42] : memref<98xf32, #tpu.memory_space<smem>>
      %455 = vector.broadcast %454 : f32 to vector<1x256xf32>
      %456 = arith.mulf %455, %24 : vector<1x256xf32>
      %457 = arith.addf %453, %456 : vector<1x256xf32>
      %c91 = arith.constant 91 : index
      %458 = memref.load %arg3[%c91] : memref<98xf32, #tpu.memory_space<smem>>
      %459 = vector.broadcast %458 : f32 to vector<1x256xf32>
      %460 = arith.mulf %459, %28 : vector<1x256xf32>
      %461 = arith.addf %457, %460 : vector<1x256xf32>
      %c43 = arith.constant 43 : index
      %462 = memref.load %arg3[%c43] : memref<98xf32, #tpu.memory_space<smem>>
      %463 = vector.broadcast %462 : f32 to vector<1x256xf32>
      %464 = arith.mulf %463, %33 : vector<1x256xf32>
      %465 = arith.addf %461, %464 : vector<1x256xf32>
      %c92 = arith.constant 92 : index
      %466 = memref.load %arg3[%c92] : memref<98xf32, #tpu.memory_space<smem>>
      %467 = vector.broadcast %466 : f32 to vector<1x256xf32>
      %468 = arith.mulf %467, %37 : vector<1x256xf32>
      %469 = arith.addf %465, %468 : vector<1x256xf32>
      %c44 = arith.constant 44 : index
      %470 = memref.load %arg3[%c44] : memref<98xf32, #tpu.memory_space<smem>>
      %471 = vector.broadcast %470 : f32 to vector<1x256xf32>
      %472 = arith.mulf %471, %42 : vector<1x256xf32>
      %473 = arith.addf %469, %472 : vector<1x256xf32>
      %c93 = arith.constant 93 : index
      %474 = memref.load %arg3[%c93] : memref<98xf32, #tpu.memory_space<smem>>
      %475 = vector.broadcast %474 : f32 to vector<1x256xf32>
      %476 = arith.mulf %475, %46 : vector<1x256xf32>
      %477 = arith.addf %473, %476 : vector<1x256xf32>
      %c45 = arith.constant 45 : index
      %478 = memref.load %arg3[%c45] : memref<98xf32, #tpu.memory_space<smem>>
      %479 = vector.broadcast %478 : f32 to vector<1x256xf32>
      %480 = arith.mulf %479, %48 : vector<1x256xf32>
      %481 = arith.addf %477, %480 : vector<1x256xf32>
      %c94 = arith.constant 94 : index
      %482 = memref.load %arg3[%c94] : memref<98xf32, #tpu.memory_space<smem>>
      %483 = vector.broadcast %482 : f32 to vector<1x256xf32>
      %484 = arith.mulf %483, %49 : vector<1x256xf32>
      %485 = arith.addf %481, %484 : vector<1x256xf32>
      %c46 = arith.constant 46 : index
      %486 = memref.load %arg3[%c46] : memref<98xf32, #tpu.memory_space<smem>>
      %487 = vector.broadcast %486 : f32 to vector<1x256xf32>
      %488 = arith.mulf %487, %54 : vector<1x256xf32>
      %489 = arith.addf %485, %488 : vector<1x256xf32>
      %c95 = arith.constant 95 : index
      %490 = memref.load %arg3[%c95] : memref<98xf32, #tpu.memory_space<smem>>
      %491 = vector.broadcast %490 : f32 to vector<1x256xf32>
      %492 = arith.mulf %491, %58 : vector<1x256xf32>
      %493 = arith.addf %489, %492 : vector<1x256xf32>
      %c47 = arith.constant 47 : index
      %494 = memref.load %arg3[%c47] : memref<98xf32, #tpu.memory_space<smem>>
      %495 = vector.broadcast %494 : f32 to vector<1x256xf32>
      %496 = arith.mulf %495, %63 : vector<1x256xf32>
      %497 = arith.addf %493, %496 : vector<1x256xf32>
      %c96 = arith.constant 96 : index
      %498 = memref.load %arg3[%c96] : memref<98xf32, #tpu.memory_space<smem>>
      %499 = vector.broadcast %498 : f32 to vector<1x256xf32>
      %500 = arith.mulf %499, %67 : vector<1x256xf32>
      %501 = arith.addf %497, %500 : vector<1x256xf32>
      %c48 = arith.constant 48 : index
      %502 = memref.load %arg3[%c48] : memref<98xf32, #tpu.memory_space<smem>>
      %503 = vector.broadcast %502 : f32 to vector<1x256xf32>
      %504 = arith.mulf %503, %72 : vector<1x256xf32>
      %505 = arith.addf %501, %504 : vector<1x256xf32>
      %c97 = arith.constant 97 : index
      %506 = memref.load %arg3[%c97] : memref<98xf32, #tpu.memory_space<smem>>
      %507 = vector.broadcast %506 : f32 to vector<1x256xf32>
      %508 = arith.mulf %507, %76 : vector<1x256xf32>
      %509 = arith.addf %505, %508 : vector<1x256xf32>
      %510 = vector.extract_strided_slice %509 {offsets = [0, 48], sizes = [1, 208], strides = [1, 1]} : vector<1x256xf32> to vector<1x208xf32>
      %511 = vector.extract_strided_slice %509 {offsets = [0, 0], sizes = [1, 48], strides = [1, 1]} : vector<1x256xf32> to vector<1x48xf32>
      %512 = tpu.concatenate %510, %511 in 1 : vector<1x208xf32>, vector<1x48xf32> -> vector<1x256xf32>
      %513 = vector.extract_strided_slice %19 {offsets = [13, 0], sizes = [1, 256], strides = [1, 1]} : vector<14x256xf32> to vector<1x256xf32>
      %514 = arith.mulf %513, %512 : vector<1x256xf32>
      %515 = arith.addf %452, %514 : vector<1x256xf32>
      %516 = arith.negf %515 : vector<1x256xf32>
      %517 = math.exp %516 : vector<1x256xf32>
      %cst_30 = arith.constant 1.000000e+00 : f32
      %518 = vector.broadcast %cst_30 : f32 to vector<1x256xf32>
      %519 = arith.addf %518, %517 : vector<1x256xf32>
      %520 = arith.divf %518, %519 : vector<1x256xf32>
      %c0_31 = arith.constant 0 : index
      %c0_32 = arith.constant 0 : index
      %c0_33 = arith.constant 0 : index
      %521 = vector.load %arg5[%c0_31, %c0_32, %c0_33] : memref<1x1x256xf32, #tpu.memory_space<vmem>>, vector<1x1x256xf32>
      %522 = vector.shape_cast %521 : vector<1x1x256xf32> to vector<1x256xf32>
      %523 = vector.shape_cast %520 : vector<1x256xf32> to vector<1x1x256xf32>
      tpu.vector_store %arg5[%c0_31, %c0_32, %c0_33], %523 {strides = array<i32>} : memref<1x1x256xf32, #tpu.memory_space<vmem>>, vector<1x1x256xf32>,
    } else {
    }
    return
  }
  func.func @transform_0(%arg0: i32, %arg1: i32) -> (i32, i32, i32) {
    %c0_i32 = arith.constant 0 : i32
    %c0_i32_0 = arith.constant 0 : i32
    return %arg0, %arg1, %c0_i32 : i32, i32, i32
  }
  func.func @transform_1(%arg0: i32, %arg1: i32) -> i32 {
    %c0_i32 = arith.constant 0 : i32
    %c0_i32_0 = arith.constant 0 : i32
    return %c0_i32 : i32
  }
  func.func @transform_2(%arg0: i32, %arg1: i32) -> (i32, i32) {
    %c0_i32 = arith.constant 0 : i32
    %c0_i32_0 = arith.constant 0 : i32
    %c0_i32_1 = arith.constant 0 : i32
    return %c0_i32, %c0_i32_0 : i32, i32
  }
  func.func @transform_3(%arg0: i32, %arg1: i32) -> (i32, i32, i32) {
    %c0_i32 = arith.constant 0 : i32
    %c0_i32_0 = arith.constant 0 : i32
    %c0_i32_1 = arith.constant 0 : i32
    return %arg0, %c0_i32, %c0_i32_0 : i32, i32, i32
  }
}

</mosaic_0001>

<bundles_post_ra>
// kernel: tpu_custom_call.1
= control target key start
LH: loop header
LB: loop body
LE: loop exit
PB: predicated region body
PF: predicated region fallthrough
CT: control target
= control target key end

     0   :  { %s3512_s0 = inlined_call_operand.hbm [shape: f32[2,4,256], index: 0, kind: input, shape index: {}]   ;;  %s3513_s1 = inlined_call_operand.vmem [shape: f32[98], index: 1, kind: input, shape index: {}]   ;;  %s3514_s2 = inlined_call_operand.hbm [shape: f32[14,256], index: 2, kind: input, shape index: {}]   ;;  %s3515_s3 = inlined_call_operand.hbm [shape: f32[2,1,256], index: 3, kind: output, shape index: {}]  }
   0x1   :  { %3678 = sst [smem:[#allocation118_spill]] %s3512_s0 }
   0x2   :  { %3679 = sst [smem:[#allocation119_spill]] %s3513_s1 }
   0x3   :  { %3680 = sst [smem:[#allocation120_spill]] %s3514_s2 }
   0x4   :  { %3681 = sst [smem:[#allocation121_spill]] %s3515_s3 }
   0x5   :  { %8 = vsyncpa [#allocation5], 0 }
   0x6   :  { %10 = vsyncpa [#allocation5 + $0x1], 0 }
   0x7   :  { %11 = vsyncpa [#allocation7], 0 }
   0x8   :  { %12 = vsyncpa [#allocation10], 0 }
   0x9   :  { %13 = vsyncpa [#allocation6], 0 }
   0xa   :  { %15 = vsyncpa [#allocation6 + $0x1], 0  ;;  %s2008_s12 = smov 0   ;;  %s2010_s13 = smov 0  }
   0xb   :  { %s2012_s14 = smov 0   ;;  %s2014_s15 = smov 0  }
   0xc   :  { %s2016_s16 = smov 0   ;;  %s2018_s17 = smov 0  }
   0xd LB: > { %3682 = sst [smem:[#allocation16_spill]] %s1945_s12  ;;  %s1570_s18 = sadd.s32 4294967295, %s1965_s17   ;;  %s1965_s17 = sphi %s2018_s17, %s21_s17   ;;  %s1961_s16 = sphi %s2016_s16, %s4096_s16   ;;  %s1957_s15 = sphi %s2014_s15, %s4095_s15   ;;  %s1953_s14 = sphi %s2012_s14, %s4094_s14   ;;  %s1949_s13 = sphi %s2010_s13, %s4093_s13   ;;  %s1945_s12 = sphi %s2008_s12, %s4092_s12  }
   0xe   : > { %3683 = sst [smem:[#allocation17_spill]] %s1949_s13  ;;  %s1571_s19 = sadd.s32 4294967294, %s1965_s17  }
   0xf   : > { %3684 = sst [smem:[#allocation18_spill]] %s1953_s14  ;;  %p55_p0 = scmp.ne.s32.totalorder %s1949_s13, %s1945_s12 }
  0x10   : > { %3685 = sst [smem:[#allocation19_spill]] %s1957_s15  ;;  %p2042_p1 = scmp.eq.s32.totalorder %s1570_s18, 0 }
  0x11   : > { %3686 = sst [smem:[#allocation20_spill]] %s1961_s16  ;;  %p2046_p2 = scmp.eq.s32.totalorder %s1570_s18, 1 }
  0x12   : > { %3687 = sst [smem:[#allocation21_spill]] %s1965_s17  ;;  %p127_p3 = scmp.eq.s32.totalorder %s1571_s19, 1 }
  0x13   : > { %s3688_s20 = scalar_select %p2042_p1, 1, 0 }
  0x14   : > { %p2052_p4 = por %p2042_p1, %p55_p0  ;;  %p1572_p5 = scmp.ge.s32.totalorder %s1965_s17, 1 }
  0x15   : > { %p2057_p6 = por %p127_p3, %p55_p0  ;;  %p134_p7 = scmp.lt.s32.totalorder %s1965_s17, 3 }
  0x16   : > { %s3690_s22 = scalar_select %p2052_p4, 1, 0 }
  0x17   : > { %s3691_s23 = scalar_select %p2057_p6, 1, 0 }
  0x18   : > { %s3693_s1 = sld [smem:[#allocation119_spill]]  ;;  %p2065_p8 = pnand %p1572_p5, %p134_p7 }
  0x19   : > { %3692 = sst [smem:[#allocation22_spill]] %s3691_s23  ;;  %s1967_s28 = smov [#allocation9]  }
  0x1a   : > { %p1702_p10 = pneg %p2065_p8  ;;  %s157_s29 = sshll.u32 %s1967_s28, 4  ;;  %s2078_s29 = int_to_ptr.vmem [resolvable:$true] %s157_s29 }
  0x1c   : > { %p2074_p11 = pnand %p1702_p10, %p2042_p1 }
  0x1e   : > { %s147_s26 = sshll.u32 %s3693_s1, 4  ;;  %p1804_p13 = pneg %p2074_p11  ;;  %s148_s26 = int_to_ptr.vmem [resolvable:$true] %s147_s26 }
  0x1f   : > { %s1802_s4 = scalar_lea.vmem %s148_s26, 16  ;;  %p1810_p5 = scmp.lt.s32.totalorder %s148_s26, %s148_s26 }
  0x20   : > { %p1803_p12 = scmp.ne.s32.totalorder %s148_s26, %s1802_s4  ;;  %p1811_p7 = scmp.lt.s32.totalorder %s1802_s4, %s1802_s4 }
  0x22   : > { %p1805_p0 = pnand %p1804_p13, %p1803_p12  ;;  %p1812_p9 = por %p1811_p7, %p1810_p5 }
  0x24   : > { %p1806_p3 = pneg %p1805_p0 }
  0x26   : > { %p1813_p6 = pnand %p1812_p9, %p1806_p3 }
  0x28   : > { %1816 = shalt.err (!%p1813_p6)
}
  0x29   : > { %s1968_s5 = smov [#allocation8]   ;;  %s3696_s2 = sld [smem:[#allocation120_spill]] }
  0x2a   : > { %1705 = dma.vmem_to_smem (!%p2074_p11), %s148_s26, 16, %s1968_s5, [#allocation7]  }
  0x2f   : > { %s1817_s8 = scalar_lea.hbm %s3696_s2, 512 }
  0x30   : > { %p1818_p10 = scmp.ne.s32.totalorder %s3696_s2, %s1817_s8  ;;  %p1824_p6 = scmp.lt.u32.totalorder %s1817_s8, %s3696_s2 }
  0x32   : > { %p1820_p12 = pnand %p1818_p10, %p1804_p13 }
  0x34   : > { %p1821_p0 = pneg %p1820_p12 }
  0x36   : > { %p1826_p9 = pnand %p1824_p6, %p1821_p0 }
  0x38   : > { %1829 = shalt.err (!%p1826_p9)
}
  0x39   : > { %s1830_s19 = scalar_lea.vmem %s2078_s29, 512  ;;  %p1838_p1 = scmp.lt.s32.totalorder %s2078_s29, %s2078_s29 }
  0x3a   : > { %p1831_p3 = scmp.ne.s32.totalorder %s2078_s29, %s1830_s19  ;;  %p1839_p10 = scmp.lt.s32.totalorder %s1830_s19, %s1830_s19 }
  0x3c   : > { %p1833_p5 = pnand %p1831_p3, %p1804_p13  ;;  %p1840_p12 = por %p1839_p10, %p1838_p1 }
  0x3e   : > { %p1834_p7 = pneg %p1833_p5 }
  0x40   : > { %p1841_p4 = pnand %p1840_p12, %p1834_p7 }
  0x42   : > { %1844 = shalt.err (!%p1841_p4)
}
  0x43   : > { %s1969_s24 = smov 256   ;;  %s1970_s25 = smov 16  }
  0x44   : > { %1708 = dma.hbm_to_vmem [thread:$0]  (!%p2074_p11), %s3696_s2, 512, %s2078_s29, [#allocation10], %s1969_s24, %s1969_s24, %s1970_s25  }
  0x45   : > { %s33_s4 = sadd.s32 1, %s1961_s16  ;;  %s42_s5 = sadd.s32 1, %s1953_s14 }
  0x46   : > { %p35_p1 = scmp.ge.s32.totalorder %s33_s4, 2  ;;  %p49_p4 = scmp.ne.s32.totalorder %s1953_s14, %s1949_s13 }
  0x47   : > { %p50_p13 = scmp.eq.s32.totalorder %s1965_s17, 0  ;;  %p1719_p0 = scmp.lt.s32.totalorder %s1965_s17, 2 }
  0x48   : > { %s4098_s4 = smov (%p35_p1, %s33_s4), 0  ;;  %p2122_p9 = por %p2046_p2, %p49_p4 }
  0x49   : > { %3697 = sst [smem:[#allocation23_spill]] %s4098_s4  ;;  %p51_p6 = por %p50_p13, %p49_p4 }
  0x4a   : > { %s3698_s6 = scalar_select %p2122_p9, 1, 0 }
  0x4b   : > { %s37_s30 = ssub.s32 %s1961_s16, %s4098_s4  ;;  %s171_s7 = sand.u32 1, %s1953_s14  }
  0x4c   : > { %3699 = sst [smem:[#allocation24_spill]] %s3698_s6  ;;  %p40_p3 = scmp.eq.s32.totalorder %s37_s30, 0 }
  0x4d   : > { %s1576_s29 = sshll.u32 %s171_s7, 3  ;;  %s1688_s8 = sshll.u32 %s1961_s16, 7 }
  0x4e   : > { %s2131_s9 = scalar_select %p40_p3, %s1953_s14, %s42_s5  }
  0x4f   : > { %s3701_s0 = sld [smem:[#allocation118_spill]]  ;;  %s175_s21 = scalar_lea.vmem [#allocation4], %s1576_s29 }
  0x50   : > { %3700 = sst [smem:[#allocation25_spill]] %s2131_s9  ;;  %s185_s19 = sshll.u32 %s175_s21, 4  ;;  %s2144_s19 = int_to_ptr.vmem [resolvable:$true] %s185_s19 }
  0x51   : > { %p2140_p2 = pnand %p1719_p0, %p51_p6  ;;  %s172_s25 = scalar_lea.sflag [#allocation5], %s171_s7 }
  0x53   : > { %p1847_p5 = pneg %p2140_p2 }
  0x55   : > { %s2136_s18 = scalar_lea.hbm %s3701_s0, %s1688_s8  ;;  %s1850_s30 = scalar_lea.hbm %s3701_s0, 256 }
  0x56   : > { %s1845_s26 = scalar_lea.hbm %s2136_s18, 128  ;;  %p1851_p12 = scmp.lt.u32.totalorder %s2136_s18, %s3701_s0 }
  0x57   : > { %p1846_p11 = scmp.ne.s32.totalorder %s2136_s18, %s1845_s26  ;;  %p1852_p1 = scmp.lt.u32.totalorder %s1850_s30, %s1845_s26 }
  0x58   : > { %p1854_p13 = scmp.lt.u32.totalorder %s1845_s26, %s2136_s18 }
  0x59   : > { %p1848_p7 = pnand %p1847_p5, %p1846_p11  ;;  %p1853_p4 = por %p1852_p1, %p1851_p12 }
  0x5b   : > { %p1849_p10 = pneg %p1848_p7  ;;  %p1855_p0 = por %p1854_p13, %p1853_p4 }
  0x5d   : > { %p1856_p6 = pnand %p1855_p0, %p1849_p10 }
  0x5f   : > { %1859 = shalt.err (!%p1856_p6)
}
  0x60   : > { %s1860_s7 = scalar_lea.vmem %s2144_s19, 128  ;;  %s1971_s10 = smov [#allocation4]  }
  0x61   : > { %p1861_p3 = scmp.ne.s32.totalorder %s2144_s19, %s1860_s7  ;;  %s1865_s11 = sshll.u32 %s1971_s10, 4  ;;  %s1866_s11 = int_to_ptr.vmem [resolvable:$false] %s1865_s11 }
  0x62   : > { %s1867_s21 = scalar_lea.vmem %s1866_s11, 256  ;;  %p1868_p9 = scmp.lt.s32.totalorder %s2144_s19, %s1866_s11 }
  0x63   : > { %p1863_p11 = pnand %p1861_p3, %p1847_p5  ;;  %p1869_p12 = scmp.lt.s32.totalorder %s1867_s21, %s1860_s7 }
  0x65   : > { %p1864_p7 = pneg %p1863_p11  ;;  %p1870_p1 = por %p1869_p12, %p1868_p9 }
  0x67   : > { %p1871_p4 = pnand %p1870_p1, %p1864_p7 }
  0x69   : > { %1874 = shalt.err (!%p1871_p4)
}
  0x6a   : > { %1712 = dma.hbm_to_vmem [thread:$0]  (!%p2140_p2), %s2136_s18, 128, %s2144_s19, %s172_s25  }
  0x6b   : > { %194 = sbr.rel (%p2065_p8) target bundleno = 604 (0x25c), region = 32 }
  0x72   : > { %s2174_s26 = sand.u32 1, %s1949_s13   ;;  %p3704_p9 = scmp.ne.s32.totalorder %s3690_s22, 0 }
  0x73   : > { %3703 = sst [smem:[#allocation26_spill]] %s2174_s26  ;;  %s1580_s28 = sshll.u32 %s2174_s26, 3 }
  0x74   : > { %s197_s5 = scalar_lea.sflag [#allocation5], %s2174_s26  ;;  %s200_s30 = scalar_lea.vmem [#allocation4], %s1580_s28 }
  0x75   : > { %1928 = dma.done.wait (%p3704_p9), %s197_s5, 128  }
  0x76   : > { %1930 = vsyncadd (%p3704_p9), %s197_s5, 4294967168  ;;  %p3705_p5 = scmp.ne.s32.totalorder %s3688_s20, 0 }
  0x78   : > { %1932 = dma.done.wait (%p3705_p5), [#allocation7], 16  }
  0x79   : > { %1934 = vsyncadd (%p3705_p5), [#allocation7], 4294967280 }
  0x7a   : > { %1936 = dma.done.wait (%p3705_p5), [#allocation10], 512  }
  0x7b   : > { %1938 = vsyncadd (%p3705_p5), [#allocation10], 4294966784 }
  0x7c   : > { %213 = sfence }
  0x7d   : > { %v236_v0 = vlaneseq  ;;  %v242_v1 = vld [vmem:[%s200_s30] sm:$0xff]  ;;  %vm247_vm0 = vcmask 1043456   ;;  %v3706_v4 = vmov 0  ;;  %v1972_v6 = vmov -inf   ;;  %s1975_s20 = smov 2   ;;  %s1976_s22 = smov 3  }
  0x7e   : > { %v245_v2 = vcombine.high %v242_v1, %v242_v1  ;;  %v287_v3 = vsel %vm247_vm0, %v242_v1, -inf  ;;  %v1973_v8 = vmov 0.0   ;;  %v248_v9 = vsel %vm247_vm0, %v242_v1, 0.0  ;;  %s1977_s27 = smov 1   ;;  %s1978_s18 = smov 127   ;;  %v2226_v58 = vld [vmem:[#allocation9] sm:$0xff] }
  0x7f   : > { %vm2190_vm1 = vcmp.lt.s32.totalorder %v236_v0, 256  ;;  %v288_v5 = vrot.slane %v287_v3, 4  ;;  %v249_v13 = vrot.slane %v248_v9, 4  ;;  %v1974_v15 = vmov 1966171168   ;;  %s1979_s19 = smov 126  }
  0x80   : > { %v3707_v4 = vsel %vm2190_vm1, 4294967295, %v3706_v4  ;;  %241 = vst.msk [vmem:[#allocation3] sm:$0x3] %vm2190_vm1, %v1972_v6  ;;  %v294_v7 = vsel %vm247_vm0, %v245_v2, -inf  ;;  %240 = vst.msk [vmem:[#allocation2] sm:$0x3] %vm2190_vm1, %v1973_v8  ;;  %v266_v16 = vunpack.c.l.s4 %v1974_v15 }
  0x81   : > { %3708 = vst [vmem:[#allocation27_spill] sm:$0xff] %v3707_v4  ;;  %v255_v10 = vsel %vm247_vm0, %v245_v2, 0.0  ;;  %v289_v11 = vmax.f32 %v287_v3, %v288_v5  ;;  %v295_v12 = vrot.slane %v294_v7, 4  ;;  %v250_v19 = vadd.f32 %v249_v13, %v248_v9  ;;  %s1980_s24 = smov 125   ;;  %s2224_s25 = sld [smem:[#allocation8 + $0x31]]  ;;  %v2228_v59 = vld [vmem:[#allocation9 + $0x8] sm:$0xff] }
  0x82   : > { %v256_v14 = vrot.slane %v255_v10, 4  ;;  %v267_v25 = vunpack.c.0.s8 %v266_v16  ;;  %v269_v26 = vshrl.u32 %v236_v0, 7  ;;  %s2230_s29 = sld [smem:[#allocation8 + $0x38]]  ;;  %s2232_s8 = sld [smem:[#allocation8 + $0x3f]]  ;;  %v428_v60 = vcombine.low %v2226_v58, %v2228_v59 }
  0x83   : > { %v290_v17 = vrot.slane %v289_v11, 2  ;;  %v296_v18 = vmax.f32 %v294_v7, %v295_v12  ;;  %v251_v23 = vrot.slane %v250_v19, 2  ;;  %s2236_s7 = sld [smem:[#allocation8 + $0x46]]  ;;  %s2238_s10 = sld [smem:[#allocation8 + $0x4d]]  ;;  %v3646_v8 = vrot.slane %v2226_v58, 1 }
  0x84   : > { %v257_v20 = vadd.f32 %v256_v14, %v255_v10  ;;  %v2198_v35 = vsub.s32 %v267_v25, %v269_v26  ;;  %v2208_v49 = vsub.s32 1, %v269_v26  ;;  %v2210_v50 = vsub.s32 0, %v269_v26  ;;  %s2240_s11 = sld [smem:[#allocation8 + $0x54]]  ;;  %s2242_s21 = sld [smem:[#allocation8 + $0x5b]] }
  0x85   : > { %v291_v21 = vmax.f32 %v289_v11, %v290_v17  ;;  %v297_v22 = vrot.slane %v296_v18, 2  ;;  %v252_v29 = vadd.f32 %v251_v23, %v250_v19  ;;  %s2244_s28 = sld [smem:[#allocation8 + $0x47]]  ;;  %s2246_s5 = sld [smem:[#allocation8 + $0x48]]  ;;  %v3645_v11 = vrot.slane %v2228_v59, 1 }
  0x86   : > { %v258_v24 = vrot.slane %v257_v20, 2  ;;  %3709 = vst [vmem:[#allocation28_spill] sm:$0xff] %v2198_v35  ;;  %s2248_s30 = sld [smem:[#allocation8]]  ;;  %v435_v61 = vrot.slane %v428_v60, %v2198_v35  ;;  %s2263_s0 = sld [smem:[#allocation8 + $0x2a]]  ;;  %v3640_v12 = vrot.slane %v2226_v58, 2  ;;  %v3639_v15 = vrot.slane %v2228_v59, 2 }
  0x87   : > { %v292_v27 = vrot.slane %v291_v21, 1  ;;  %v298_v28 = vmax.f32 %v296_v18, %v297_v22  ;;  %v253_v33 = vrot.slane %v252_v29, 1  ;;  %v286_v42 = vld [vmem:[#allocation3] sm:$0x3]  ;;  %v243_v45 = vld [vmem:[#allocation2] sm:$0x3]  ;;  %v536_v1 = vstv %s2224_s25 }
  0x88   : > { %v259_v30 = vadd.f32 %v258_v24, %v257_v20  ;;  %3710 = sst [smem:[#allocation29_spill]] %s2224_s25  ;;  %s2265_s1 = sld [smem:[#allocation8 + $0x1]]  ;;  %v436_v62 = vcombine.high %v435_v61, %v435_v61  ;;  %v660_v2 = vstv %s2230_s29  ;;  %v786_v3 = vstv %s2232_s8 }
  0x89   : > { %v293_v31 = vmax.f32 %v291_v21, %v292_v27  ;;  %v299_v32 = vrot.slane %v298_v28, 1  ;;  %v254_v37 = vadd.f32 %v253_v33, %v252_v29  ;;  %3711 = sst [smem:[#allocation30_spill]] %s2230_s29  ;;  %s2267_s2 = sld [smem:[#allocation8 + $0x8]]  ;;  %v916_v5 = vstv %s2236_s7 }
  0x8a   : > { %v260_v34 = vrot.slane %v259_v30, 1  ;;  %3712 = sst [smem:[#allocation31_spill]] %s2232_s8  ;;  %s2269_s4 = sld [smem:[#allocation8 + $0xf]]  ;;  %v443_v63 = vrot.slane %v436_v62, %v2198_v35  ;;  %v1036_v6 = vstv %s2238_s10  ;;  %v1166_v7 = vstv %s2240_s11 }
  0x8b   : > { %v300_v36 = vmax.f32 %v298_v28, %v299_v32  ;;  %3713 = sst [smem:[#allocation32_spill]] %s2236_s7  ;;  %s2273_s9 = sld [smem:[#allocation8 + $0x1d]]  ;;  %v1296_v10 = vstv %s2242_s21  ;;  %v928_v14 = vstv %s2244_s28  ;;  %v3648_v16 = vrot.slane %v2226_v58, 4 }
  0x8c   : > { %v261_v38 = vadd.f32 %v260_v34, %v259_v30  ;;  %3714 = sst [smem:[#allocation33_spill]] %s2238_s10  ;;  %s2271_s16 = sld [smem:[#allocation8 + $0x16]]  ;;  %v444_v0 = vcombine.high %v443_v63, %v443_v63  ;;  %v940_v17 = vstv %s2246_s5  ;;  %v3649_v18 = vrot.slane %v2228_v59, 4 }
  0x8d   : > { %v303_v39 = vcombine.low %v293_v31, %v300_v36  ;;  %3715 = sst [smem:[#allocation34_spill]] %s2240_s11  ;;  %s2275_s14 = sld [smem:[#allocation8 + $0x24]]  ;;  %vm345_vm2 = vcmask 23552   ;;  %vm377_vm3 = vcmask 15360   ;;  %vm406_vm4 = vcmask 7168  }
  0x8e   : > { %v264_v40 = vcombine.low %v254_v37, %v261_v38  ;;  %3716 = sst [smem:[#allocation35_spill]] %s2242_s21  ;;  %s2277_s13 = sld [smem:[#allocation8 + $0x2b]]  ;;  %vm452_vm5 = vcmask 1039360   ;;  %vm479_vm6 = vcmask 1031168   ;;  %vm506_vm7 = vcmask 1022976  }
  0x8f   : > { %v310_v41 = vrot.slane %v303_v39, %v2198_v35  ;;  %3717 = sst [smem:[#allocation36_spill]] %s2244_s28  ;;  %s2279_s17 = sld [smem:[#allocation8 + $0x33]]  ;;  %vm890_vm8 = vcmask 130048   ;;  %vm764_vm9 = vcmask 261120   ;;  %vm640_vm10 = vcmask 392192  }
  0x90   : > { %v271_v43 = vrot.slane %v264_v40, %v2198_v35  ;;  %3718 = sst [smem:[#allocation37_spill]] %s2246_s5  ;;  %s2281_s23 = sld [smem:[#allocation8 + $0x35]]  ;;  %vm1139_vm11 = vcmask 916480   ;;  %vm1269_vm12 = vcmask 785408   ;;  %vm1399_vm13 = vcmask 654336  }
  0x91   : > { %v317_v44 = vrot.slane %v310_v41, %v2198_v35  ;;  %3719 = sst [smem:[#allocation38_spill]] %s2248_s30  ;;  %s2283_s12 = sld [smem:[#allocation8 + $0x39]] }
  0x92   : > { %v278_v46 = vrot.slane %v271_v43, %v2198_v35  ;;  %3726 = sst [smem:[#allocation45_spill]] %s2263_s0  ;;  %s2286_s3 = sld [smem:[#allocation8 + $0x17]] }
  0x93   : > { %v319_v47 = vmax.f32 %v286_v42, %v317_v44  ;;  %3727 = sst [smem:[#allocation46_spill]] %s2265_s1  ;;  %s2288_s6 = sld [smem:[#allocation8 + $0x3a]] }
  0x94   : > { %v280_v48 = vadd.f32 %v278_v46, %v243_v45  ;;  %3728 = sst [smem:[#allocation47_spill]] %s2267_s2  ;;  %s2290_s15 = sld [smem:[#allocation8 + $0x2]] }
  0x95   : > { %320 = vst.msk [vmem:[#allocation3] sm:$0x3] %vm2190_vm1, %v319_v47  ;;  %3729 = sst [smem:[#allocation48_spill]] %s2269_s4  ;;  %s2292_s26 = sld [smem:[#allocation8 + $0x3c]] }
  0x96   : > { %285 = vst.msk [vmem:[#allocation2] sm:$0x3] %vm2190_vm1, %v280_v48  ;;  %3730 = sst [smem:[#allocation49_spill]] %s2271_s16  ;;  %s2327_s11 = sld [smem:[#allocation8 + $0xb]] }
  0x97   : > { %3731 = sst [smem:[#allocation50_spill]] %s2273_s9  ;;  %s2329_s10 = sld [smem:[#allocation8 + $0x43]] }
  0x98   : > { %3732 = sst [smem:[#allocation51_spill]] %s2275_s14  ;;  %s2337_s21 = sld [smem:[#allocation8 + $0x6]] }
  0x99   : > { %3733 = sst [smem:[#allocation52_spill]] %s2277_s13  ;;  %s2296_s13 = sld [smem:[#allocation8 + $0x34]]  ;;  %v684_v45 = vstv %s2288_s6 }
  0x9a   : > { %3734 = sst [smem:[#allocation53_spill]] %s2279_s17  ;;  %s2304_s14 = sld [smem:[#allocation8 + $0x9]] }
  0x9b   : > { %3735 = sst [smem:[#allocation54_spill]] %s2281_s23  ;;  %s2294_s17 = sld [smem:[#allocation8 + $0x3]] }
  0x9c   : > { %v2212_v51 = vld [vmem:[#allocation3] sm:$0x3]  ;;  %3736 = sst [smem:[#allocation55_spill]] %s2283_s12  ;;  %s2298_s23 = sld [smem:[#allocation8 + $0x36]] }
  0x9d   : > { %v356_v52 = vrot.slane %v2212_v51, %v2208_v49  ;;  %v363_v53 = vrot.slane %v2212_v51, %v2210_v50  ;;  %v324_v54 = vld [vmem:[#allocation2] sm:$0x3]  ;;  %3737 = sst [smem:[#allocation56_spill]] %s2286_s3  ;;  %s2300_s12 = sld [smem:[#allocation8 + $0x40]]  ;;  %v2322_v9 = vmul.f32 %v444_v0, %v2212_v51 }
  0x9e   : > { %v2218_v55 = vmul.f32 0.25, %v324_v54  ;;  %3738 = sst [smem:[#allocation57_spill]] %s2288_s6  ;;  %s2302_s3 = sld [smem:[#allocation8 + $0x4]] }
  0x9f   : > { %390 = vrot.lane.b32.xlu0 %v356_v52, %s1975_s20  ;;  %357 = vrot.lane.b32.xlu1 %v356_v52, %s1976_s22  ;;  %3739 = sst [smem:[#allocation58_spill]] %s2290_s15  ;;  %s2309_s15 = sld [smem:[#allocation8 + $0xa]]  ;;  %v582_v32 = vstv %s2296_s13 }
  0xa0   : > { %v335_v56 = vrot.slane %v2218_v55, %v2208_v49  ;;  %v342_v57 = vrot.slane %v2218_v55, %v2210_v50  ;;  %3740 = sst [smem:[#allocation59_spill]] %s2292_s26  ;;  %v2332_v13 = vmul.f32 %v444_v0, %v2218_v55  ;;  %s2339_s7 = sld [smem:[#allocation8 + $0x3d]]  ;;  %v2393_v43 = vmul.f32 %v582_v32, %v2322_v9 }
  0xa1   : > { %3744 = sst [smem:[#allocation63_spill]] %s2304_s14  ;;  %s2311_s26 = sld [smem:[#allocation8 + $0x41]]  ;;  %v566_v24 = vstv %s2294_s17 }
  0xa2   : > { %3741 = sst [smem:[#allocation60_spill]] %s2298_s23  ;;  %s2345_s28 = sld [smem:[#allocation8 + $0x37]]  ;;  %v2377_v37 = vmul.f32 %v566_v24, %v2332_v13 }
  0xa3   : > { %417 = vrot.lane.b32.xlu0 %v356_v52, %s1977_s27  ;;  %364 = vrot.lane.b32.xlu1 %v363_v53, %s1976_s22  ;;  %3742 = sst [smem:[#allocation61_spill]] %s2300_s12  ;;  %s2317_s12 = sld [smem:[#allocation8 + $0x5]] }
  0xa4   : > { %3743 = sst [smem:[#allocation62_spill]] %s2302_s3  ;;  %s2319_s3 = sld [smem:[#allocation8 + $0x3b]] }
  0xa5   : > { %3747 = sst [smem:[#allocation66_spill]] %s2329_s10  ;;  %s2347_s8 = sld [smem:[#allocation8 + $0x4e]]  ;;  %v690_v40 = vstv %s2309_s15 }
  0xa6   : > { %3748 = sst [smem:[#allocation67_spill]] %s2339_s7  ;;  %s2355_s10 = sld [smem:[#allocation8 + $0x42]]  ;;  %v2413_v54 = vmul.f32 %v690_v40, %v2332_v13 }
  0xa7   : > { %464 = vrot.lane.b32.xlu0 %v363_v53, %s1978_s18  ;;  %393 = vrot.lane.b32.xlu1 %v363_v53, %s1975_s20  ;;  %3745 = sst [smem:[#allocation64_spill]] %s2311_s26  ;;  %s2353_s25 = sld [smem:[#allocation8 + $0x11]] }
  0xa8   : > { %3749 = sst [smem:[#allocation68_spill]] %s2345_s28  ;;  %s3753_s30 = sld [smem:[#allocation53_spill]] }
  0xa9   : > { %3746 = sst [smem:[#allocation65_spill]] %s2317_s12  ;;  %s2361_s28 = sld [smem:[#allocation8 + $0xc]] }
  0xaa   : > { %s2379_s1 = sld [smem:[#allocation8 + $0x3e]]  ;;  %s2381_s2 = sld [smem:[#allocation8 + $0x12]]  ;;  %v706_v41 = vstv %s2319_s3 }
  0xab   : > { %420 = vrot.lane.b32.xlu1 %v363_v53, %s1977_s27  ;;  %336 = vrot.lane.b32.xlu0 %v335_v56, %s1976_s22  ;;  %3750 = sst [smem:[#allocation69_spill]] %s2347_s8  ;;  %s2387_s13 = sld [smem:[#allocation8 + $0x4f]]  ;;  %v2416_v55 = vmul.f32 %v706_v41, %v2322_v9 }
  0xac   : > { %s2389_s16 = sld [smem:[#allocation8 + $0x55]]  ;;  %s2397_s5 = sld [smem:[#allocation8 + $0x1f]]  ;;  %v832_v61 = vstv %s2355_s10 }
  0xad   : > { %s2399_s29 = sld [smem:[#allocation8 + $0x51]]  ;;  %s2405_s3 = sld [smem:[#allocation8 + $0x13]]  ;;  %v816_v60 = vstv %s2353_s25  ;;  %v2457_v40 = vmul.f32 %v832_v61, %v2322_v9 }
  0xae   : > { %v560_v38 = vstv %s3753_s30  ;;  %s2407_s15 = sld [smem:[#allocation8 + $0x50]]  ;;  %s2418_s0 = sld [smem:[#allocation8 + $0x14]] }
  0xaf   : > { %466 = vrot.lane.b32.xlu1 %v356_v52, %s1978_s18  ;;  %343 = vrot.lane.b32.xlu0 %v342_v57, %s1976_s22  ;;  %s2253_s22 = sld [smem:[#allocation8 + $0x7]]  ;;  %s2420_s4 = sld [smem:[#allocation8 + $0x56]]  ;;  %3773 = vst [vmem:[#allocation80_spill] sm:$0xff] %v2457_v40 }
  0xb0   : > { %3759 = sst [smem:[#allocation72_spill]] %s2379_s1  ;;  %s2445_s30 = sld [smem:[#allocation8 + $0x52]] }
  0xb1   : > { %3761 = sst [smem:[#allocation73_spill]] %s2381_s2  ;;  %s2426_s23 = sld [smem:[#allocation8 + $0x1e]] }
  0xb2   : > { %3763 = sst [smem:[#allocation74_spill]] %s2387_s13  ;;  %s2438_s6 = sld [smem:[#allocation8 + $0x26]] }
  0xb3   : > { %375 = vrot.lane.b32.xlu1 %v342_v57, %s1975_s20  ;;  %372 = vrot.lane.b32.xlu0 %v335_v56, %s1975_s20  ;;  %s2250_s20 = sld [smem:[#allocation8 + $0x32]]  ;;  %3764 = sst [smem:[#allocation75_spill]] %s2389_s16 }
  0xb4   : > { %s2459_s12 = sld [smem:[#allocation8 + $0x20]]  ;;  %s2461_s17 = sld [smem:[#allocation8 + $0x57]]  ;;  %v1082_v63 = vstv %s2407_s15 }
  0xb5   : > { %3721 = sst [smem:[#allocation40_spill]] %s2253_s22  ;;  %s2363_s22 = sld [smem:[#allocation8 + $0x10]]  ;;  %v2510_v32 = vmul.f32 %v1082_v63, %v2322_v9 }
  0xb6   : > { %3767 = sst [smem:[#allocation76_spill]] %s2420_s4  ;;  %s2467_s14 = sld [smem:[#allocation8 + $0x25]] }
  0xb7   : > { %404 = vrot.lane.b32.xlu1 %v342_v57, %s1977_s27  ;;  %401 = vrot.lane.b32.xlu0 %v335_v56, %s1977_s27  ;;  %s2255_s27 = sld [smem:[#allocation8 + $0xe]]  ;;  %3771 = sst [smem:[#allocation78_spill]] %s2445_s30  ;;  %3777 = vst [vmem:[#allocation84_spill] sm:$0xff] %v2510_v32 }
  0xb8   : > { %s2469_s26 = sld [smem:[#allocation8 + $0x5d]]  ;;  %s2477_s9 = sld [smem:[#allocation8 + $0x21]] }
  0xb9   : > { %3720 = sst [smem:[#allocation39_spill]] %s2250_s20  ;;  %v548_v20 = vstv %s2250_s20  ;;  %s2428_s20 = sld [smem:[#allocation8 + $0x5c]] }
  0xba   : > { %s2479_s7 = sld [smem:[#allocation8 + $0x22]]  ;;  %s2485_s25 = sld [smem:[#allocation8 + $0x2d]] }
  0xbb   : > { %493 = vrot.lane.b32.xlu1 %v356_v52, %s1979_s19  ;;  %491 = vrot.lane.b32.xlu0 %v363_v53, %s1979_s19  ;;  %s2487_s10 = sld [smem:[#allocation8 + $0x5e]]  ;;  %s2497_s15 = sld [smem:[#allocation8 + $0x59]] }
  0xbc   : > { %s2505_s8 = sld [smem:[#allocation8 + $0x5f]]  ;;  %s2517_s13 = sld [smem:[#allocation8 + $0x49]] }
  0xbd   : > { %3722 = sst [smem:[#allocation41_spill]] %s2255_s27  ;;  %s2369_s27 = sld [smem:[#allocation8 + $0xd]] }
  0xbe   : > { %3774 = sst [smem:[#allocation81_spill]] %s2469_s26  ;;  %s2524_s2 = sld [smem:[#allocation8 + $0x28]] }
  0xbf   : > { %450 = vrot.lane.b32.xlu1 %v335_v56, %s1978_s18  ;;  %448 = vrot.lane.b32.xlu0 %v342_v57, %s1978_s18  ;;  %s2257_s18 = sld [smem:[#allocation8 + $0x15]]  ;;  %3768 = sst [smem:[#allocation77_spill]] %s2428_s20 }
  0xc0   : > { %s2526_s1 = sld [smem:[#allocation8 + $0x4a]]  ;;  %s2542_s4 = sld [smem:[#allocation8 + $0x2c]] }
  0xc1   : > { %3775 = sst [smem:[#allocation82_spill]] %s2497_s15  ;;  %s2552_s20 = sld [smem:[#allocation8 + $0x60]]  ;;  %v1342_v62 = vstv %s2487_s10 }
  0xc2   : > { %s2565_s30 = sld [smem:[#allocation8 + $0x2f]]  ;;  %s2571_s16 = sld [smem:[#allocation8 + $0x30]]  ;;  %v2586_v47 = vmul.f32 %v1342_v62, %v2322_v9  ;;  %v962_v0 = vstv %s2517_s13 }
  0xc3   : > { %477 = vrot.lane.b32.xlu1 %v335_v56, %s1979_s19  ;;  %475 = vrot.lane.b32.xlu0 %v342_v57, %s1979_s19  ;;  %s2259_s19 = sld [smem:[#allocation8 + $0x1c]]  ;;  %s2580_s10 = sld [smem:[#allocation8 + $0x4b]]  ;;  %v2613_v30 = vmul.f32 %v962_v0, %v2322_v9 }
  0xc4   : > { %3756 = sst [smem:[#allocation70_spill]] %s2369_s27  ;;  %s2507_s27 = sld [smem:[#allocation8 + $0x18]]  ;;  %3787 = vst [vmem:[#allocation94_spill] sm:$0xff] %v2586_v47 }
  0xc5   : > { %3723 = sst [smem:[#allocation42_spill]] %s2257_s18  ;;  %v910_v23 = vstv %s2257_s18  ;;  %s3757_s18 = sld [smem:[#allocation55_spill]]  ;;  %3792 = vst [vmem:[#allocation99_spill] sm:$0xff] %v2613_v30 }
  0xc6   : > { %3778 = sst [smem:[#allocation85_spill]] %s2526_s1  ;;  %s2590_s26 = sld [smem:[#allocation8 + $0x19]] }
  0xc7   : > { %504 = vrot.lane.b32.xlu1 %v335_v56, %s1980_s24  ;;  %502 = vrot.lane.b32.xlu0 %v342_v57, %s1980_s24  ;;  %v2454_v57 = vmul.f32 %v816_v60, %v2332_v13  ;;  %v1212_v60 = vstv %s2461_s17  ;;  %s2550_s17 = sld [smem:[#allocation8 + $0x5a]]  ;;  %3780 = sst [smem:[#allocation87_spill]] %s2552_s20  ;;  %v1326_v56 = vstv %s2485_s25 }
  0xc8   : > { %v2559_v46 = vmul.f32 %v1212_v60, %v2322_v9  ;;  %3782 = sst [smem:[#allocation89_spill]] %s2565_s30  ;;  %s2577_s25 = sld [smem:[#allocation8 + $0x61]]  ;;  %v2583_v34 = vmul.f32 %v1326_v56, %v2332_v13 }
  0xc9   : > { %3724 = sst [smem:[#allocation43_spill]] %s2259_s19  ;;  %s2371_s19 = sld [smem:[#allocation8 + $0x44]] }
  0xca   : > { %3781 = vst [vmem:[#allocation88_spill] sm:$0xff] %v2559_v46  ;;  %3783 = sst [smem:[#allocation90_spill]] %s2571_s16  ;;  %v946_v48 = vstv %s2507_s27  ;;  %3786 = vst [vmem:[#allocation93_spill] sm:$0xff] %v2583_v34  ;;  %s2597_s27 = sld [smem:[#allocation8 + $0x1a]] }
  0xcb   : > { %520 = vrot.lane.b32.xlu1 %v356_v52, %s1980_s24  ;;  %518 = vrot.lane.b32.xlu0 %v363_v53, %s1980_s24  ;;  %s2261_s24 = sld [smem:[#allocation8 + $0x23]]  ;;  %v672_v44 = vstv %s3757_s18  ;;  %s2447_s18 = sld [smem:[#allocation8 + $0x58]]  ;;  %v1066_v53 = vstv %s2397_s5  ;;  %v2605_v39 = vmul.f32 %v946_v48, %v2332_v13 }
  0xcc   : > { %s2495_s5 = sld [smem:[#allocation8 + $0x53]]  ;;  %v2503_v61 = vmul.f32 %v1066_v53, %v2332_v13  ;;  %v1196_v52 = vstv %s2438_s6  ;;  %s2532_s6 = sld [smem:[#allocation8 + $0x29]] }
  0xcd   : > { %v2539_v41 = vmul.f32 %v1196_v52, %v2332_v13  ;;  %3785 = sst [smem:[#allocation92_spill]] %s2580_s10  ;;  %s2599_s15 = sld [smem:[#allocation8 + $0x1b]]  ;;  %3791 = vst [vmem:[#allocation98_spill] sm:$0xff] %v2605_v39 }
  0xce   : > { %3776 = vst [vmem:[#allocation83_spill] sm:$0xff] %v2503_v61  ;;  %3784 = sst [smem:[#allocation91_spill]] %s2577_s25  ;;  %s3818_s1 = sld [smem:[#allocation61_spill]] }
  0xcf   : > { %3758 = sst [smem:[#allocation71_spill]] %s2371_s19  ;;  %s2515_s19 = sld [smem:[#allocation8 + $0x27]]  ;;  %3779 = vst [vmem:[#allocation86_spill] sm:$0xff] %v2539_v41 }
  0xd0   : > { %3788 = sst [smem:[#allocation95_spill]] %s2590_s26  ;;  %s3820_s26 = sld [smem:[#allocation38_spill]] }
  0xd1   : > { %3725 = sst [smem:[#allocation44_spill]] %s2261_s24  ;;  %s2436_s24 = sld [smem:[#allocation8 + $0x45]] }
  0xd2   : > { %3772 = sst [smem:[#allocation79_spill]] %s2447_s18  ;;  %s2563_s18 = sld [smem:[#allocation8 + $0x2e]] }
  0xd3   : > { %3789 = sst [smem:[#allocation96_spill]] %s2597_s27  ;;  %s3819_s27 = sld [smem:[#allocation64_spill]] }
  0xd4   : > { %3790 = sst [smem:[#allocation97_spill]] %s2599_s15  ;;  %s3821_s16 = sld [smem:[#allocation40_spill]] }
  0xd5   : > { %s3822_s15 = sld [smem:[#allocation41_spill]]  ;;  %s3825_s20 = sld [smem:[#allocation43_spill]] }
  0xd6   : > { %v3826_v35 = vstv %s3820_s26  ;;  %s3828_s25 = sld [smem:[#allocation44_spill]]  ;;  %s3829_s10 = sld [smem:[#allocation49_spill]] }
  0xd7   : > { %v3827_v30 = vmov %v3826_v35  ;;  %s3832_s26 = sld [smem:[#allocation45_spill]]  ;;  %s3835_s13 = sld [smem:[#allocation46_spill]] }
  0xd8   : > { %s3842_s30 = sld [smem:[#allocation54_spill]] }
  0xda   : > { %v3833_v47 = vstv %s3821_s16  ;;  %s3847_s16 = sld [smem:[#allocation56_spill]] }
 0x111   : > { %v2554_v52 = vpop.permute.xlu0 %390  ;;  %v358_v51 = vpop.permute.xlu1 %357 }
 0x115   : > { %v418_v63 = vpop.permute.xlu0 %417  ;;  %v365_v33 = vpop.permute.xlu1 %364 }
 0x116   : > { %v366_v56 = vsel %vm345_vm2, %v365_v33, %v358_v51  ;;  %v369_v62 = vsel %vm345_vm2, %v358_v51, %v365_v33 }
 0x117   : > { %v370_v51 = vmul.f32 %v369_v62, %v2226_v58  ;;  %v371_v53 = vmul.f32 %v366_v56, %v2228_v59 }
 0x119   : > { %v465_v60 = vpop.permute.xlu0 %464  ;;  %v394_v42 = vpop.permute.xlu1 %393  ;;  %v2647_v13 = vmul.f32 %v536_v1, %v370_v51  ;;  %v2651_v28 = vmul.f32 %v536_v1, %v371_v53  ;;  %v2661_v56 = vmul.f32 %v660_v2, %v371_v53  ;;  %v2667_v1 = vmul.f32 %v786_v3, %v370_v51 }
 0x11a   : > { %v395_v33 = vsel %vm377_vm3, %v394_v42, %v2554_v52  ;;  %v398_v48 = vsel %vm377_vm3, %v2554_v52, %v394_v42  ;;  %v2657_v52 = vmul.f32 %v660_v2, %v370_v51  ;;  %v2671_v31 = vmul.f32 %v786_v3, %v371_v53 }
 0x11b   : > { %v2675_v42 = vmul.f32 %v398_v48, %v3646_v8  ;;  %v2679_v2 = vmul.f32 %v395_v33, %v3645_v11  ;;  %v917_v29 = vmul.f32 %v916_v5, %v370_v51  ;;  %v2691_v3 = vmul.f32 %v1036_v6, %v371_v53 }
 0x11c   : > { %v2695_v26 = vmul.f32 %v1166_v7, %v370_v51  ;;  %v2699_v48 = vmul.f32 %v1166_v7, %v371_v53  ;;  %v2711_v22 = vmul.f32 %v1296_v10, %v370_v51  ;;  %v2715_v7 = vmul.f32 %v1296_v10, %v371_v53 }
 0x11d   : > { %v421_v0 = vpop.permute.xlu1 %420  ;;  %v337_v9 = vpop.permute.xlu0 %336  ;;  %3801 = vst [vmem:[#allocation100_spill] sm:$0xff] %v2679_v2  ;;  %3803 = vst [vmem:[#allocation102_spill] sm:$0xff] %v2691_v3 }
 0x11e   : > { %v422_v62 = vsel %vm406_vm4, %v421_v0, %v418_v63  ;;  %v425_v27 = vsel %vm406_vm4, %v418_v63, %v421_v0  ;;  %v918_v63 = vmul.f32 %v916_v5, %v371_v53  ;;  %v2687_v0 = vmul.f32 %v1036_v6, %v370_v51  ;;  %3804 = vst [vmem:[#allocation103_spill] sm:$0xff] %v2695_v26 }
 0x11f   : > { %3806 = vst [vmem:[#allocation104_spill] sm:$0xff] %v2699_v48  ;;  %v2703_v33 = vmul.f32 %v425_v27, %v3640_v12  ;;  %v2707_v5 = vmul.f32 %v422_v62, %v3639_v15  ;;  %3810 = vst [vmem:[#allocation107_spill] sm:$0xff] %v2711_v22  ;;  %v2722_v62 = vmul.f32 %v928_v14, %v2675_v42 }
 0x120   : > { %3802 = vst [vmem:[#allocation101_spill] sm:$0xff] %v2687_v0  ;;  %3812 = vst [vmem:[#allocation108_spill] sm:$0xff] %v2715_v7  ;;  %v2727_v51 = vmul.f32 %v928_v14, %v2679_v2  ;;  %v2741_v12 = vmul.f32 %v548_v20, %v2675_v42  ;;  %v3836_v7 = vstv %s3822_s15  ;;  %s3851_s15 = sld [smem:[#allocation47_spill]] }
 0x121   : > { %3807 = vst [vmem:[#allocation105_spill] sm:$0xff] %v2703_v33  ;;  %3809 = vst [vmem:[#allocation106_spill] sm:$0xff] %v2707_v5  ;;  %v467_v6 = vpop.permute.xlu1 %466  ;;  %v344_v25 = vpop.permute.xlu0 %343  ;;  %v2746_v14 = vmul.f32 %v940_v17, %v2703_v33  ;;  %v2775_v19 = vmul.f32 %v560_v38, %v2703_v33  ;;  %v2788_v24 = vmul.f32 %v684_v45, %v2707_v5 }
 0x122   : > { %v346_v21 = vsel %vm345_vm2, %v344_v25, %v337_v9  ;;  %v349_v27 = vsel %vm345_vm2, %v337_v9, %v344_v25  ;;  %v468_v15 = vsel %vm452_vm5, %v465_v60, %v467_v6  ;;  %v472_v25 = vsel %vm452_vm5, %v467_v6, %v465_v60 }
 0x123   : > { %v350_v10 = vmul.f32 %v349_v27, %v2226_v58  ;;  %v351_v53 = vmul.f32 %v346_v21, %v2228_v59  ;;  %v2736_v9 = vmul.f32 %v548_v20, %v2679_v2  ;;  %3816 = vst [vmem:[#allocation109_spill] sm:$0xff] %v2746_v14  ;;  %v2751_v21 = vmul.f32 %v940_v17, %v2707_v5 }
 0x124   : > { %v2756_v6 = vmul.f32 %v672_v44, %v2679_v2  ;;  %v2761_v20 = vmul.f32 %v672_v44, %v2675_v42  ;;  %v2770_v17 = vmul.f32 %v560_v38, %v2707_v5  ;;  %v2779_v36 = vmul.f32 %v468_v15, %v3648_v16 }
 0x125   : > { %3817 = vst [vmem:[#allocation110_spill] sm:$0xff] %v2751_v21  ;;  %v376_v27 = vpop.permute.xlu1 %375  ;;  %v373_v60 = vpop.permute.xlu0 %372  ;;  %v911_v11 = vmul.f32 %v910_v23, %v350_v10  ;;  %v912_v8 = vmul.f32 %v910_v23, %v351_v53  ;;  %v2783_v44 = vmul.f32 %v472_v25, %v3649_v18  ;;  %v2793_v23 = vmul.f32 %v684_v45, %v2703_v33 }
 0x126   : > { %v3823_v15 = vstv %s3818_s1  ;;  %v3824_v25 = vstv %s3819_s27  ;;  %v531_v45 = vmul.f32 %v3826_v35, %v350_v10  ;;  %v532_v39 = vmul.f32 %v3827_v30, %v351_v53 }
 0x127   : > { %v919_v4 = vadd.f32 %v917_v29, %v911_v11  ;;  %v920_v38 = vadd.f32 %v918_v63, %v912_v8  ;;  %v2798_v16 = vmul.f32 %v3823_v15, %v2679_v2  ;;  %v2803_v18 = vmul.f32 %v3824_v25, %v2707_v5 }
 0x128   : > { %v378_v11 = vsel %vm377_vm3, %v376_v27, %v373_v60  ;;  %v381_v8 = vsel %vm377_vm3, %v373_v60, %v376_v27  ;;  %v3830_v15 = vrot.slane %v2226_v58, 1  ;;  %v3831_v25 = vrot.slane %v2228_v59, 1 }
 0x129   : > { %v405_v29 = vpop.permute.xlu1 %404  ;;  %v402_v63 = vpop.permute.xlu0 %401  ;;  %v2823_v27 = vmul.f32 %v3833_v47, %v350_v10  ;;  %v3834_v60 = vmov %v3833_v47  ;;  %v2829_v46 = vmul.f32 %v3836_v7, %v350_v10  ;;  %v540_v61 = vadd.f32 %v2651_v28, %v532_v39 }
 0x12a   : > { %v2813_v21 = vmul.f32 %v3830_v15, %v381_v8  ;;  %v2817_v14 = vmul.f32 %v3831_v25, %v378_v11  ;;  %v407_v35 = vsel %vm406_vm4, %v405_v29, %v402_v63  ;;  %v410_v30 = vsel %vm406_vm4, %v402_v63, %v405_v29 }
 0x12b   : > { %v656_v34 = vmul.f32 %v3834_v60, %v351_v53  ;;  %v3837_v8 = vmov %v3836_v7  ;;  %v3838_v11 = vstv %s3825_s20  ;;  %v3841_v29 = vrot.slane %v2226_v58, 2  ;;  %s3857_s20 = sld [smem:[#allocation48_spill]] }
 0x12c   : > { %v2833_v15 = vmul.f32 %v3837_v8, %v351_v53  ;;  %v2837_v25 = vmul.f32 %v3838_v11, %v350_v10  ;;  %v3839_v22 = vmov %v3838_v11  ;;  %v3843_v63 = vrot.slane %v2228_v59, 2 }
 0x12d   : > { %v2841_v41 = vmul.f32 %v3839_v22, %v351_v53  ;;  %v2845_v47 = vmul.f32 %v3841_v29, %v410_v30  ;;  %v3844_v7 = vstv %s3828_s25  ;;  %v3849_v22 = vstv %s3829_s10  ;;  %v494_v29 = vpop.permute.xlu1 %493  ;;  %s3859_s25 = sld [smem:[#allocation58_spill]] }
 0x12e   : > { %v2849_v60 = vmul.f32 %v3843_v63, %v407_v35  ;;  %v2853_v48 = vmul.f32 %v3844_v7, %v350_v10  ;;  %v3846_v8 = vmov %v3844_v7  ;;  %v923_v32 = vmul.f32 %v3849_v22, %v2813_v21  ;;  %v492_v35 = vpop.permute.xlu0 %491  ;;  %s3866_s10 = sld [smem:[#allocation50_spill]] }
 0x12f   : > { %3840 = vst [vmem:[#allocation111_spill] sm:$0xff] %v2841_v41  ;;  %v2857_v11 = vmul.f32 %v3846_v8, %v351_v53  ;;  %v3850_v26 = vmov %v3849_v22  ;;  %v3852_v63 = vstv %s3832_s26  ;;  %v3856_v8 = vstv %s3835_s13  ;;  %s3874_s26 = sld [smem:[#allocation51_spill]]  ;;  %s3880_s13 = sld [smem:[#allocation62_spill]] }
 0x130   : > { %3845 = vst [vmem:[#allocation112_spill] sm:$0xff] %v2853_v48  ;;  %v924_v30 = vmul.f32 %v3850_v26, %v2817_v14  ;;  %v2867_v5 = vmul.f32 %v3852_v63, %v350_v10  ;;  %v3854_v7 = vmov %v3852_v63  ;;  %v925_v22 = vadd.f32 %v923_v32, %v919_v4 }
 0x131   : > { %3848 = vst [vmem:[#allocation113_spill] sm:$0xff] %v2857_v11  ;;  %v2871_v48 = vmul.f32 %v3854_v7, %v351_v53  ;;  %v544_v11 = vmul.f32 %v3856_v8, %v2817_v14  ;;  %v3858_v26 = vstv %s3842_s30  ;;  %v539_v10 = vadd.f32 %v2647_v13, %v531_v45  ;;  %s3872_s30 = sld [smem:[#allocation63_spill]] }
 0x132   : > { %3853 = vst [vmem:[#allocation114_spill] sm:$0xff] %v2867_v5  ;;  %v926_v2 = vadd.f32 %v924_v30, %v920_v38  ;;  %v2880_v3 = vmul.f32 %v3858_v26, %v2783_v44  ;;  %v3860_v53 = vmov %v3856_v8  ;;  %v3861_v7 = vstv %s3847_s16  ;;  %s3883_s16 = sld [smem:[#allocation60_spill]] }
 0x133   : > { %3855 = vst [vmem:[#allocation115_spill] sm:$0xff] %v2871_v48  ;;  %v543_v63 = vmul.f32 %v3860_v53, %v2813_v21  ;;  %v935_v8 = vmul.f32 %v3861_v7, %v2845_v47  ;;  %v3862_v28 = vmov %v3861_v7  ;;  %v3863_v4 = vmov %v3858_v26  ;;  %v451_v7 = vpop.permute.xlu1 %450 }
 0x134   : > { %v936_v39 = vmul.f32 %v3862_v28, %v2849_v60  ;;  %v2895_v32 = vmul.f32 %v3863_v4, %v2779_v36  ;;  %v3864_v38 = vstv %s3851_s15  ;;  %v931_v45 = vadd.f32 %v2722_v62, %v925_v22  ;;  %v449_v28 = vpop.permute.xlu0 %448  ;;  %s3887_s15 = sld [smem:[#allocation65_spill]] }
 0x135   : > { %v2900_v30 = vmul.f32 %v3864_v38, %v2813_v21  ;;  %v3865_v26 = vmov %v3864_v38  ;;  %v932_v53 = vadd.f32 %v2727_v51, %v926_v2  ;;  %v3867_v48 = vstv %s3857_s20  ;;  %s3898_s20 = sld [smem:[#allocation59_spill]] }
 0x136   : > { %v668_v13 = vmul.f32 %v3865_v26, %v2817_v14  ;;  %v2910_v4 = vmul.f32 %v3867_v48, %v2813_v21  ;;  %v3868_v5 = vmov %v3867_v48  ;;  %v546_v41 = vadd.f32 %v544_v11, %v540_v61 }
 0x137   : > { %v2915_v38 = vmul.f32 %v3868_v5, %v2817_v14  ;;  %v3869_v26 = vstv %s3859_s25  ;;  %v2920_v33 = vadd.f32 %v935_v8, %v931_v45  ;;  %v2922_v62 = vadd.f32 %v936_v39, %v932_v53  ;;  %s3902_s25 = sld [smem:[#allocation68_spill]] }
 0x138   : > { %v556_v40 = vmul.f32 %v3869_v26, %v2849_v60  ;;  %v499_v2 = vsel %vm479_vm6, %v494_v29, %v492_v35  ;;  %v457_v51 = vsel %vm452_vm5, %v451_v7, %v449_v28  ;;  %v453_v22 = vsel %vm452_vm5, %v449_v28, %v451_v7  ;;  %v478_v7 = vpop.permute.xlu1 %477  ;;  %v476_v28 = vpop.permute.xlu0 %475 }
 0x139   : > { %3870 = vst [vmem:[#allocation116_spill] sm:$0xff] %v2920_v33  ;;  %3871 = vst [vmem:[#allocation117_spill] sm:$0xff] %v2922_v62  ;;  %v552_v48 = vadd.f32 %v2736_v9, %v546_v41  ;;  %v545_v0 = vadd.f32 %v543_v63, %v539_v10  ;;  %v3873_v5 = vmov %v3869_v26  ;;  %v3875_v11 = vstv %s3866_s10  ;;  %s3908_s10 = sld [smem:[#allocation52_spill]] }
 0x13a   : > { %v555_v61 = vmul.f32 %v3873_v5, %v2845_v47  ;;  %v2934_v8 = vmul.f32 %v3875_v11, %v2813_v21  ;;  %v3876_v39 = vmov %v3875_v11  ;;  %v495_v53 = vsel %vm479_vm6, %v492_v35, %v494_v29 }
 0x13b   : > { %v2939_v45 = vmul.f32 %v3876_v39, %v2817_v14  ;;  %v664_v41 = vadd.f32 %v2661_v56, %v656_v34  ;;  %v3877_v9 = vrot.slane %v2228_v59, 4  ;;  %v484_v63 = vsel %vm479_vm6, %v478_v7, %v476_v28 }
 0x13c   : > { %v558_v26 = vadd.f32 %v556_v40, %v552_v48  ;;  %v551_v5 = vadd.f32 %v2741_v12, %v545_v0  ;;  %v3878_v11 = vrot.slane %v2228_v59, 5  ;;  %v3879_v29 = vrot.slane %v2226_v58, 4 }
 0x13d   : > { %v2945_v10 = vmul.f32 %v3877_v9, %v457_v51  ;;  %v670_v62 = vadd.f32 %v668_v13, %v664_v41  ;;  %v3881_v34 = vstv %s3872_s30  ;;  %v3882_v51 = vstv %s3874_s26  ;;  %s3916_s26 = sld [smem:[#allocation70_spill]] }
 0x13e   : > { %v2951_v39 = vmul.f32 %v499_v2, %v3878_v11  ;;  %v2955_v35 = vmul.f32 %v3879_v29, %v453_v22  ;;  %v680_v56 = vmul.f32 %v3881_v34, %v2849_v60  ;;  %v2963_v9 = vmul.f32 %v3882_v51, %v2813_v21  ;;  %v505_v29 = vpop.permute.xlu1 %504  ;;  %v503_v34 = vpop.permute.xlu0 %502 }
 0x13f   : > { %v480_v12 = vsel %vm479_vm6, %v476_v28, %v478_v7  ;;  %v564_v40 = vadd.f32 %v2770_v17, %v558_v26  ;;  %v557_v0 = vadd.f32 %v555_v61, %v551_v5  ;;  %v3884_v2 = vmov %v3882_v51 }
 0x140   : > { %v2970_v48 = vmul.f32 %v3884_v2, %v2817_v14  ;;  %v3885_v13 = vrot.slane %v2226_v58, 5  ;;  %v3886_v41 = vmov %v3878_v11  ;;  %v676_v7 = vadd.f32 %v2756_v6, %v670_v62 }
 0x141   : > { %v2978_v11 = vmul.f32 %v3886_v41, %v484_v63  ;;  %v511_v17 = vsel %vm506_vm7, %v505_v29, %v503_v34  ;;  %v3888_v61 = vrot.slane %v2377_v37, %v2208_v49  ;;  %v3889_v26 = vstv %s3880_s13  ;;  %s3929_s13 = sld [smem:[#allocation73_spill]] }
 0x142   : > { %v2974_v22 = vmul.f32 %v495_v53, %v3885_v13  ;;  %v600_v53 = vmul.f32 %v3889_v26, %v2945_v10  ;;  %v563_v5 = vadd.f32 %v2775_v19, %v557_v0  ;;  %v3890_v51 = vmov %v3885_v13 }
 0x143   : > { %v580_v28 = vadd.f32 %v3888_v61, %v564_v40  ;;  %v2991_v63 = vmul.f32 %v3890_v51, %v480_v12  ;;  %v3891_v2 = vstv %s3883_s16  ;;  %v3892_v6 = vmov %v3889_v26 }
 0x144   : > { %v618_v13 = vmul.f32 %v3891_v2, %v2951_v39  ;;  %v599_v62 = vmul.f32 %v3892_v6, %v2955_v35  ;;  %v682_v41 = vadd.f32 %v680_v56, %v676_v7  ;;  %v507_v33 = vsel %vm506_vm7, %v503_v34, %v505_v29  ;;  %v521_v6 = vpop.permute.xlu1 %520  ;;  %v519_v56 = vpop.permute.xlu0 %518 }
 0x145   : > { %v3893_v40 = vrot.slane %v2393_v43, %v2208_v49  ;;  %v3894_v19 = vrot.slane %v2377_v37, %v2210_v50  ;;  %v3895_v12 = vstv %s2327_s11  ;;  %v3896_v51 = vrot.slane %v2228_v59, 6 }
 0x146   : > { %v724_v26 = vmul.f32 %v3895_v12, %v2945_v10  ;;  %v3897_v29 = vstv %s3887_s15  ;;  %v688_v7 = vadd.f32 %v2788_v24, %v682_v41  ;;  %v663_v37 = vadd.f32 %v2657_v52, %v2823_v27  ;;  %s3935_s15 = sld [smem:[#allocation69_spill]] }
 0x147   : > { %v596_v61 = vadd.f32 %v3893_v40, %v580_v28  ;;  %v579_v0 = vadd.f32 %v3894_v19, %v563_v5  ;;  %v3011_v2 = vmul.f32 %v3896_v51, %v511_v17  ;;  %v612_v34 = vmul.f32 %v3897_v29, %v2978_v11 }
 0x148   : > { %v522_v28 = vsel %vm506_vm7, %v519_v56, %v521_v6  ;;  %v526_v5 = vsel %vm506_vm7, %v521_v6, %v519_v56  ;;  %v3899_v40 = vrot.slane %v2393_v43, %v2210_v50  ;;  %v3900_v12 = vrot.slane %v2226_v58, 6 }
 0x149   : > { %v602_v17 = vadd.f32 %v600_v53, %v596_v61  ;;  %v3901_v24 = vrot.slane %v2228_v59, 6  ;;  %v3903_v52 = vrot.slane %v2413_v54, %v2208_v49  ;;  %v669_v53 = vadd.f32 %v2900_v30, %v663_v37 }
 0x14a   : > { %v595_v19 = vadd.f32 %v3899_v40, %v579_v0  ;;  %v3026_v51 = vmul.f32 %v3900_v12, %v507_v33  ;;  %v3904_v0 = vmov %v3897_v29  ;;  %v3905_v6 = vstv %s3872_s30  ;;  %s3914_s30 = sld [smem:[#allocation67_spill]] }
 0x14b   : > { %v3030_v41 = vmul.f32 %v526_v5, %v3901_v24  ;;  %v704_v27 = vadd.f32 %v3903_v52, %v688_v7  ;;  %v608_v43 = vadd.f32 %v2880_v3, %v602_v17  ;;  %v611_v33 = vmul.f32 %v3904_v0, %v2991_v63 }
 0x14c   : > { %v601_v61 = vadd.f32 %v599_v62, %v595_v19  ;;  %v679_v59 = vmul.f32 %v3905_v6, %v2845_v47  ;;  %v3906_v56 = vmov %v3900_v12  ;;  %v3907_v5 = vstv %s3883_s16  ;;  %s3932_s16 = sld [smem:[#allocation66_spill]] }
 0x14d   : > { %v3045_v29 = vmul.f32 %v522_v28, %v3906_v56  ;;  %v617_v7 = vmul.f32 %v3907_v5, %v2974_v22  ;;  %v3909_v30 = vrot.slane %v2416_v55, %v2208_v49  ;;  %v3910_v62 = vstv %s3898_s20 }
 0x14e   : > { %v730_v37 = vmul.f32 %v3910_v62, %v2783_v44  ;;  %v614_v17 = vadd.f32 %v612_v34, %v608_v43  ;;  %v3911_v40 = vstv %s2337_s21  ;;  %v607_v58 = vadd.f32 %v2895_v32, %v601_v61  ;;  %s3920_s21 = sld [smem:[#allocation72_spill]] }
 0x14f   : > { %v720_v3 = vadd.f32 %v3909_v30, %v704_v27  ;;  %v624_v19 = vmul.f32 %v3911_v40, %v3011_v2  ;;  %v675_v28 = vadd.f32 %v2761_v20, %v669_v53  ;;  %v3912_v12 = vstv %s3902_s25  ;;  %s4057_s25 = sld [smem:[#allocation96_spill]] }
 0x150   : > { %v630_v24 = vmul.f32 %v3912_v12, %v3030_v41  ;;  %v3913_v52 = vmov %v3911_v40  ;;  %v3915_v6 = vstv %s2361_s28  ;;  %v620_v34 = vadd.f32 %v618_v13, %v614_v17 }
 0x151   : > { %v623_v0 = vmul.f32 %v3913_v52, %v3026_v51  ;;  %v726_v27 = vadd.f32 %v724_v26, %v720_v3  ;;  %v736_v56 = vmul.f32 %v3915_v6, %v2978_v11  ;;  %v613_v43 = vadd.f32 %v611_v33, %v607_v58 }
 0x152   : > { %v681_v5 = vadd.f32 %v679_v59, %v675_v28  ;;  %v790_v32 = vadd.f32 %v2671_v31, %v2833_v15  ;;  %v3917_v20 = vstv %s3908_s10  ;;  %v3918_v61 = vmov %v3912_v12  ;;  %s4070_s10 = sld [smem:[#allocation97_spill]] }
 0x153   : > { %v3075_v53 = vmul.f32 %v3917_v20, %v2813_v21  ;;  %v629_v30 = vmul.f32 %v3918_v61, %v3045_v29  ;;  %v732_v26 = vadd.f32 %v730_v37, %v726_v27  ;;  %v3919_v3 = vstv %s2363_s22  ;;  %s3938_s22 = sld [smem:[#allocation71_spill]] }
 0x154   : > { %v806_v62 = vmul.f32 %v3919_v3, %v2849_v60  ;;  %v626_v40 = vadd.f32 %v624_v19, %v620_v34  ;;  %v619_v13 = vadd.f32 %v617_v7, %v613_v43  ;;  %v687_v33 = vadd.f32 %v2793_v23, %v681_v5 }
 0x155   : > { %v796_v59 = vadd.f32 %v2915_v38, %v790_v32  ;;  %v738_v31 = vadd.f32 %v736_v56, %v732_v26  ;;  %v3921_v15 = vstv %s3914_s30  ;;  %v3922_v17 = vstv %s3916_s26  ;;  %s4080_s30 = sld [smem:[#allocation26_spill]]  ;;  %s4081_s26 = sld [smem:[#allocation19_spill]] }
 0x156   : > { %v742_v21 = vmul.f32 %v3921_v15, %v2951_v39  ;;  %v748_v58 = vmul.f32 %v3922_v17, %v3011_v2  ;;  %v3923_v37 = vstv %s2327_s11  ;;  %v632_v12 = vadd.f32 %v630_v24, %v626_v40  ;;  %s1981_s11 = smov 48  }
 0x157   : > { %v723_v28 = vmul.f32 %v3923_v37, %v2955_v35  ;;  %v625_v52 = vadd.f32 %v623_v0, %v619_v13  ;;  %v3924_v7 = vrot.slane %v2413_v54, %v2210_v50  ;;  %v802_v38 = vadd.f32 %v2798_v16, %v796_v59 }
 0x158   : > { %v3925_v19 = vmov %v3917_v20  ;;  %v744_v6 = vadd.f32 %v742_v21, %v738_v31  ;;  %v3926_v56 = vstv %s3920_s21  ;;  %v789_v24 = vadd.f32 %v2667_v1, %v2829_v46  ;;  %634 = vrot.lane.b32.xlu0 %v632_v12, %s1981_s11  ;;  %v3941_v12 = vld [vmem:[#allocation101_spill] sm:$0xff]  ;;  %s4082_s21 = sld [smem:[#allocation24_spill]] }
 0x159   : > { %v703_v23 = vadd.f32 %v3924_v7, %v687_v33  ;;  %v3101_v27 = vmul.f32 %v3925_v19, %v2817_v14  ;;  %v754_v34 = vmul.f32 %v3926_v56, %v3030_v41  ;;  %v631_v54 = vadd.f32 %v629_v30, %v625_v52  ;;  %v3943_v19 = vld [vmem:[#allocation105_spill] sm:$0xff] }
 0x15a   : > { %v3927_v16 = vrot.slane %v2416_v55, %v2210_v50  ;;  %v3928_v14 = vstv %s3898_s20  ;;  %v808_v5 = vadd.f32 %v806_v62, %v802_v38  ;;  %v750_v32 = vadd.f32 %v748_v58, %v744_v6  ;;  %s1985_s20 = smov 96  }
 0x15b   : > { %v729_v43 = vmul.f32 %v3928_v14, %v2779_v36  ;;  %v795_v20 = vadd.f32 %v2910_v4, %v789_v24  ;;  %v3930_v61 = vstv %s3818_s1  ;;  %v3931_v1 = vmov %v3919_v3  ;;  %638 = vrot.lane.b32.xlu1 %v631_v54, %s1981_s11  ;;  %s3950_s1 = sld [smem:[#allocation74_spill]]  ;;  %s1583_s11 = sshll.u32 %s4080_s30, 1 }
 0x15c   : > { %v719_v0 = vadd.f32 %v3927_v16, %v703_v23  ;;  %v799_v46 = vmul.f32 %v3930_v61, %v2675_v42  ;;  %v805_v26 = vmul.f32 %v3931_v1, %v2845_v47  ;;  %v3933_v55 = vstv %s2361_s28  ;;  %s1982_s28 = smov 32   ;;  %v3946_v16 = vld [vmem:[#allocation80_spill] sm:$0xff] }
 0x15d   : > { %v735_v3 = vmul.f32 %v3933_v55, %v2991_v63  ;;  %v3934_v40 = vmov %v3921_v15  ;;  %v814_v13 = vadd.f32 %v2803_v18, %v808_v5  ;;  %v756_v4 = vadd.f32 %v754_v34, %v750_v32 }
 0x15e   : > { %v725_v30 = vadd.f32 %v723_v28, %v719_v0  ;;  %v741_v62 = vmul.f32 %v3934_v40, %v2974_v22  ;;  %v3936_v33 = vmov %v3922_v17  ;;  %v3937_v31 = vmov %v3926_v56  ;;  %p4086_p2 = scmp.ne.s32.totalorder %s4082_s21, 0 }
 0x15f   : > { %v747_v59 = vmul.f32 %v3936_v33, %v3026_v51  ;;  %v753_v15 = vmul.f32 %v3937_v31, %v3045_v29  ;;  %v801_v21 = vadd.f32 %v799_v46, %v795_v20  ;;  %v3939_v58 = vrot.slane %v2454_v57, %v2208_v49  ;;  %758 = vrot.lane.b32.xlu0 %v756_v4, %s1982_s28 }
 0x160   : > { %v731_v17 = vadd.f32 %v729_v43, %v725_v30  ;;  %v3940_v28 = vstv %s3929_s13  ;;  %v1039_v52 = vadd.f32 %v3941_v12, %v2837_v25  ;;  %v3942_v7 = vstv %s3932_s16  ;;  %s1689_s13 = sshll.u32 %s4081_s26, 5  ;;  %s231_s16 = scalar_lea.vmem [#allocation11], %s1583_s11 }
 0x161   : > { %v830_v37 = vadd.f32 %v3939_v58, %v814_v13  ;;  %v850_v18 = vmul.f32 %v3940_v28, %v2945_v10  ;;  %v856_v23 = vmul.f32 %v3942_v7, %v2783_v44  ;;  %v807_v38 = vadd.f32 %v805_v26, %v801_v21 }
 0x162   : > { %v3944_v6 = vstv %s3819_s27  ;;  %v3945_v34 = vstv %s3935_s15  ;;  %v737_v54 = vadd.f32 %v735_v3, %v731_v17  ;;  %v3947_v25 = vrot.slane %v3946_v16, %v2208_v49  ;;  %s3966_s27 = sld [smem:[#allocation75_spill]] }
 0x163   : > { %v811_v56 = vmul.f32 %v3944_v6, %v3943_v19  ;;  %v1049_v24 = vmul.f32 %v3945_v34, %v2675_v42  ;;  %v1045_v14 = vadd.f32 %v2934_v8, %v1039_v52  ;;  %v3948_v43 = vstv %s2426_s23  ;;  %v3961_v34 = vld [vmem:[#allocation100_spill] sm:$0xff]  ;;  %s3972_s23 = sld [smem:[#allocation78_spill]] }
 0x164   : > { %v846_v0 = vadd.f32 %v3947_v25, %v830_v37  ;;  %v1055_v5 = vmul.f32 %v3948_v43, %v2845_v47  ;;  %v3949_v32 = vstv %s2405_s3  ;;  %v3951_v61 = vstv %s3938_s22  ;;  %v3957_v37 = vld [vmem:[#allocation111_spill] sm:$0xff]  ;;  %s4042_s3 = sld [smem:[#allocation95_spill]] }
 0x165   : > { %v862_v20 = vmul.f32 %v3949_v32, %v2978_v11  ;;  %v868_v46 = vmul.f32 %v3951_v61, %v2951_v39  ;;  %v3952_v1 = vstv %s2418_s0  ;;  %v813_v30 = vadd.f32 %v811_v56, %v807_v38  ;;  %s3983_s0 = sld [smem:[#allocation76_spill]] }
 0x166   : > { %v874_v26 = vmul.f32 %v3952_v1, %v3011_v2  ;;  %v743_v55 = vadd.f32 %v741_v62, %v737_v54  ;;  %v852_v3 = vadd.f32 %v850_v18, %v846_v0  ;;  %v3953_v8 = vstv %s2436_s24  ;;  %s1983_s24 = smov 16  }
 0x167   : > { %v880_v40 = vmul.f32 %v3953_v8, %v3030_v41  ;;  %v1051_v13 = vadd.f32 %v1049_v24, %v1045_v14  ;;  %v3954_v4 = vrot.slane %v2454_v57, %v2210_v50  ;;  %v3955_v31 = vmov %v3940_v28  ;;  %v3958_v28 = vld [vmem:[#allocation102_spill] sm:$0xff] }
 0x168   : > { %v849_v21 = vmul.f32 %v3955_v31, %v2955_v35  ;;  %v3956_v17 = vmov %v3942_v7  ;;  %v1040_v62 = vadd.f32 %v3958_v28, %v3957_v37  ;;  %v749_v18 = vadd.f32 %v747_v59, %v743_v55 }
 0x169   : > { %v829_v33 = vadd.f32 %v3954_v4, %v813_v30  ;;  %v855_v58 = vmul.f32 %v3956_v17, %v2779_v36  ;;  %v858_v12 = vadd.f32 %v856_v23, %v852_v3  ;;  %v1057_v52 = vadd.f32 %v1055_v5, %v1051_v13  ;;  %v3969_v3 = vld [vmem:[#allocation83_spill] sm:$0xff]  ;;  %v3973_v17 = vld [vmem:[#allocation106_spill] sm:$0xff] }
 0x16a   : > { %v3959_v7 = vstv %s3950_s1  ;;  %v3960_v57 = vrot.slane %v3946_v16, %v2210_v50  ;;  %v1046_v56 = vadd.f32 %v2939_v45, %v1040_v62  ;;  %v3962_v24 = vstv %s3935_s15  ;;  %v3975_v62 = vld [vmem:[#allocation112_spill] sm:$0xff]  ;;  %s1467_s15 = sshll.u32 %s231_s16, 4  ;;  %s4084_s1 = sld [smem:[#allocation121_spill]]  ;;  %s3463_s15 = int_to_ptr.vmem [resolvable:$true] %s1467_s15 }
 0x16b   : > { %v1061_v38 = vmul.f32 %v3959_v7, %v3943_v19  ;;  %v1050_v54 = vmul.f32 %v3962_v24, %v3961_v34  ;;  %v3963_v25 = vmov %v3948_v43  ;;  %v755_v59 = vadd.f32 %v753_v15, %v749_v18  ;;  %v3976_v18 = vld [vmem:[#allocation103_spill] sm:$0xff] }
 0x16c   : > { %v845_v6 = vadd.f32 %v3960_v57, %v829_v33  ;;  %v1056_v0 = vmul.f32 %v3963_v25, %v2849_v60  ;;  %v864_v23 = vadd.f32 %v862_v20, %v858_v12  ;;  %v3964_v14 = vmov %v3949_v32 }
 0x16d   : > { %v861_v43 = vmul.f32 %v3964_v14, %v2991_v63  ;;  %v1063_v5 = vadd.f32 %v1061_v38, %v1057_v52  ;;  %v3965_v16 = vmov %v3951_v61  ;;  %v3967_v45 = vmov %v3952_v1  ;;  %762 = vrot.lane.b32.xlu1 %v755_v59, %s1982_s28  ;;  %v3977_v52 = vld [vmem:[#allocation84_spill] sm:$0xff] }
 0x16e   : > { %v851_v32 = vadd.f32 %v849_v21, %v845_v6  ;;  %v867_v61 = vmul.f32 %v3965_v16, %v2974_v22  ;;  %v873_v1 = vmul.f32 %v3967_v45, %v3026_v51  ;;  %v1052_v30 = vadd.f32 %v1050_v54, %v1046_v56 }
 0x16f   : > { %v870_v55 = vadd.f32 %v868_v46, %v864_v23  ;;  %v3968_v15 = vmov %v3953_v8  ;;  %v3970_v8 = vrot.slane %v3969_v3, %v2210_v50  ;;  %v3971_v4 = vstv %s2459_s12  ;;  %s3997_s12 = sld [smem:[#allocation77_spill]] }
 0x170   : > { %v879_v20 = vmul.f32 %v3968_v15, %v3045_v29  ;;  %v1099_v33 = vmul.f32 %v3971_v4, %v2955_v35  ;;  %v857_v31 = vadd.f32 %v855_v58, %v851_v32  ;;  %v1058_v21 = vadd.f32 %v1056_v0, %v1052_v30 }
 0x171   : > { %v1079_v13 = vadd.f32 %v3970_v8, %v1063_v5  ;;  %v3974_v37 = vmov %v3959_v7  ;;  %v1169_v46 = vadd.f32 %v3976_v18, %v3975_v62  ;;  %v876_v12 = vadd.f32 %v874_v26, %v870_v55 }
 0x172   : > { %v1062_v28 = vmul.f32 %v3974_v37, %v3973_v17  ;;  %v3978_v7 = vrot.slane %v3977_v52, %v2210_v50  ;;  %v3979_v57 = vstv %s2399_s29  ;;  %v3980_v56 = vstv %s3966_s27  ;;  %s4013_s29 = sld [smem:[#allocation81_spill]]  ;;  %s3461_s27 = scalar_lea.hbm %s4084_s1, %s1689_s13 }
 0x173   : > { %v1105_v6 = vmul.f32 %v3979_v57, %v2779_v36  ;;  %v1179_v24 = vmul.f32 %v3980_v56, %v2675_v42  ;;  %v863_v58 = vadd.f32 %v861_v43, %v857_v31  ;;  %v1175_v25 = vadd.f32 %v2963_v9, %v1169_v46 }
 0x174   : > { %v1095_v38 = vadd.f32 %v3978_v7, %v1079_v13  ;;  %v1064_v54 = vadd.f32 %v1062_v28, %v1058_v21  ;;  %v3981_v0 = vstv %s2467_s14  ;;  %v882_v26 = vadd.f32 %v880_v40, %v876_v12  ;;  %s4003_s14 = sld [smem:[#allocation79_spill]] }
 0x175   : > { %v1185_v59 = vmul.f32 %v3981_v0, %v2845_v47  ;;  %v3982_v14 = vstv %s2477_s9  ;;  %v3984_v32 = vstv %s3972_s23  ;;  %v869_v45 = vadd.f32 %v867_v61, %v863_v58  ;;  %s4007_s9 = sld [smem:[#allocation82_spill]]  ;;  %s1453_s23 = scalar_lea.sflag [#allocation6], %s4080_s30 }
 0x176   : > { %v1101_v23 = vadd.f32 %v1099_v33, %v1095_v38  ;;  %v1111_v5 = vmul.f32 %v3982_v14, %v2991_v63  ;;  %v1117_v16 = vmul.f32 %v3984_v32, %v2974_v22  ;;  %v3985_v43 = vrot.slane %v3969_v3, %v2208_v49  ;;  %884 = vrot.lane.b32.xlu0 %v882_v26, %s1983_s24  ;;  %v3989_v33 = vld [vmem:[#allocation113_spill] sm:$0xff]  ;;  %v3990_v3 = vld [vmem:[#allocation104_spill] sm:$0xff] }
 0x177   : > { %v3986_v9 = vmov %v3971_v4  ;;  %v1181_v15 = vadd.f32 %v1179_v24, %v1175_v25  ;;  %v3987_v8 = vstv %s2479_s7  ;;  %v3988_v4 = vmov %v3979_v57  ;;  %s1984_s7 = smov 112  }
 0x178   : > { %v1080_v30 = vadd.f32 %v3985_v43, %v1064_v54  ;;  %v1100_v55 = vmul.f32 %v3986_v9, %v2945_v10  ;;  %v1107_v40 = vadd.f32 %v1105_v6, %v1101_v23  ;;  %v1123_v13 = vmul.f32 %v3987_v8, %v3026_v51 }
 0x179   : > { %v1106_v61 = vmul.f32 %v3988_v4, %v2783_v44  ;;  %v1170_v31 = vadd.f32 %v3990_v3, %v3989_v33  ;;  %v875_v21 = vadd.f32 %v873_v1, %v869_v45  ;;  %v3991_v37 = vrot.slane %v3977_v52, %v2208_v49  ;;  %v4006_v4 = vld [vmem:[#allocation107_spill] sm:$0xff] }
 0x17a   : > { %v1187_v62 = vadd.f32 %v1185_v59, %v1181_v15  ;;  %v3992_v18 = vstv %s3983_s0  ;;  %v1113_v12 = vadd.f32 %v1111_v5, %v1107_v40  ;;  %v3993_v38 = vmov %v3980_v56  ;;  %s1875_s0 = scalar_lea.vmem %s3463_s15, 32 }
 0x17b   : > { %v1096_v28 = vadd.f32 %v3991_v37, %v1080_v30  ;;  %v1191_v46 = vmul.f32 %v3992_v18, %v3943_v19  ;;  %v1176_v7 = vadd.f32 %v2970_v48, %v1170_v31  ;;  %v1180_v57 = vmul.f32 %v3993_v38, %v3961_v34  ;;  %p1876_p8 = scmp.ne.s32.totalorder %s3463_s15, %s1875_s0 }
 0x17c   : > { %v3994_v6 = vmov %v3981_v0  ;;  %v881_v1 = vadd.f32 %v879_v20, %v875_v21  ;;  %v3995_v52 = vmov %v3982_v14  ;;  %v1119_v25 = vadd.f32 %v1117_v16, %v1113_v12  ;;  %v4009_v21 = vld [vmem:[#allocation88_spill] sm:$0xff] }
 0x17d   : > { %v1186_v56 = vmul.f32 %v3994_v6, %v2849_v60  ;;  %v1102_v24 = vadd.f32 %v1100_v55, %v1096_v28  ;;  %v1112_v58 = vmul.f32 %v3995_v52, %v2978_v11  ;;  %v1193_v54 = vadd.f32 %v1191_v46, %v1187_v62  ;;  %p1877_p10 = pnand %p1876_p8, %p4086_p2 }
 0x17e   : > { %v3996_v0 = vstv %s2495_s5  ;;  %v3998_v48 = vmov %v3984_v32  ;;  %v1182_v23 = vadd.f32 %v1180_v57, %v1176_v7  ;;  %888 = vrot.lane.b32.xlu1 %v881_v1, %s1983_s24  ;;  %v3999_v20 = vmov %v3987_v8  ;;  %v4000_v32 = vld [vmem:[#allocation86_spill] sm:$0xff]  ;;  %s4049_s5 = sld [smem:[#allocation91_spill]]  ;;  %s1987_s24 = smov [#allocation11]  }
 0x17f   : > { %v1129_v59 = vmul.f32 %v3996_v0, %v3045_v29  ;;  %v1118_v26 = vmul.f32 %v3998_v48, %v2951_v39  ;;  %v1108_v14 = vadd.f32 %v1106_v61, %v1102_v24  ;;  %v1124_v5 = vmul.f32 %v3999_v20, %v3011_v2  ;;  %v4005_v8 = vld [vmem:[#allocation114_spill] sm:$0xff]  ;;  %p1878_p13 = pneg %p1877_p10 }
 0x180   : > { %v4001_v45 = vrot.slane %v4000_v32, %v2210_v50  ;;  %v4002_v16 = vstv %s2515_s19  ;;  %v1125_v9 = vadd.f32 %v1123_v13, %v1119_v25  ;;  %v1188_v55 = vadd.f32 %v1186_v56, %v1182_v23  ;;  %s4027_s19 = sld [smem:[#allocation89_spill]] }
 0x181   : > { %v1229_v30 = vmul.f32 %v4002_v16, %v2955_v35  ;;  %v4004_v15 = vmov %v3992_v18  ;;  %v1299_v61 = vadd.f32 %v4006_v4, %v4005_v8  ;;  %v1114_v33 = vadd.f32 %v1112_v58, %v1108_v14 }
 0x182   : > { %v1209_v43 = vadd.f32 %v4001_v45, %v1193_v54  ;;  %v1192_v40 = vmul.f32 %v4004_v15, %v3973_v17  ;;  %v4008_v3 = vmov %v3996_v0  ;;  %v4010_v37 = vrot.slane %v4009_v21, %v2210_v50 }
 0x183   : > { %v1130_v31 = vmul.f32 %v4008_v3, %v3030_v41  ;;  %v4011_v62 = vstv %s3997_s12  ;;  %v1131_v18 = vadd.f32 %v1129_v59, %v1125_v9  ;;  %v1305_v12 = vadd.f32 %v3075_v53, %v1299_v61  ;;  %v4023_v9 = vld [vmem:[#allocation115_spill] sm:$0xff]  ;;  %s1879_s12 = sshll.u32 %s1987_s24, 4  ;;  %s1880_s12 = int_to_ptr.vmem [resolvable:$false] %s1879_s12 }
 0x184   : > { %v1225_v28 = vadd.f32 %v4010_v37, %v1209_v43  ;;  %v1309_v13 = vmul.f32 %v4011_v62, %v2675_v42  ;;  %v1194_v46 = vadd.f32 %v1192_v40, %v1188_v55  ;;  %v4012_v7 = vstv %s2542_s4  ;;  %s4036_s4 = sld [smem:[#allocation90_spill]]  ;;  %p1882_p0 = scmp.lt.s32.totalorder %s3463_s15, %s1880_s12 }
 0x185   : > { %v1315_v38 = vmul.f32 %v4012_v7, %v2845_v47  ;;  %v1120_v57 = vadd.f32 %v1118_v26, %v1114_v33  ;;  %v4014_v56 = vstv %s4003_s14  ;;  %v4015_v24 = vstv %s2524_s2  ;;  %1135 = vrot.lane.b32.xlu0 %v1131_v18, %s1984_s7  ;;  %s4031_s2 = sld [smem:[#allocation87_spill]]  ;;  %s1881_s14 = scalar_lea.vmem %s1880_s12, 64 }
 0x186   : > { %v1231_v6 = vadd.f32 %v1229_v30, %v1225_v28  ;;  %v1235_v1 = vmul.f32 %v4014_v56, %v2779_v36  ;;  %v1241_v52 = vmul.f32 %v4015_v24, %v2991_v63  ;;  %v4016_v42 = vstv %s4007_s9  ;;  %p1883_p6 = scmp.lt.s32.totalorder %s1881_s14, %s1875_s0 }
 0x187   : > { %v1247_v58 = vmul.f32 %v4016_v42, %v2974_v22  ;;  %v4017_v53 = vrot.slane %v4000_v32, %v2208_v49  ;;  %v4018_v54 = vmov %v4002_v16  ;;  %v1311_v0 = vadd.f32 %v1309_v13, %v1305_v12 }
 0x188   : > { %v1230_v25 = vmul.f32 %v4018_v54, %v2945_v10  ;;  %v1126_v59 = vadd.f32 %v1124_v5, %v1120_v57  ;;  %v1237_v48 = vadd.f32 %v1235_v1, %v1231_v6  ;;  %v4019_v26 = vstv %s2532_s6  ;;  %v4024_v5 = vld [vmem:[#allocation108_spill] sm:$0xff]  ;;  %s3377_s6 = sld [smem:[#allocation8 + $0x4c]]  ;;  %p1884_p3 = por %p1883_p6, %p1882_p0 }
 0x189   : > { %v1210_v47 = vadd.f32 %v4017_v53, %v1194_v46  ;;  %v1253_v23 = vmul.f32 %v4019_v26, %v3026_v51  ;;  %v4020_v14 = vmov %v4014_v56  ;;  %v4021_v45 = vrot.slane %v4009_v21, %v2208_v49 }
 0x18a   : > { %v1236_v20 = vmul.f32 %v4020_v14, %v2783_v44  ;;  %v1317_v43 = vadd.f32 %v1315_v38, %v1311_v0  ;;  %v4022_v16 = vstv %s4013_s29  ;;  %v1300_v55 = vadd.f32 %v4024_v5, %v4023_v9  ;;  %v4033_v38 = vld [vmem:[#allocation93_spill] sm:$0xff]  ;;  %v4048_v9 = vld [vmem:[#allocation110_spill] sm:$0xff]  ;;  %p1885_p11 = pnand %p1884_p3, %p1878_p13 }
 0x18b   : > { %v1226_v32 = vadd.f32 %v4021_v45, %v1210_v47  ;;  %v1321_v30 = vmul.f32 %v4022_v16, %v3943_v19  ;;  %v1132_v15 = vadd.f32 %v1130_v31, %v1126_v59  ;;  %v1243_v40 = vadd.f32 %v1241_v52, %v1237_v48 }
 0x18c   : > { %v4025_v8 = vmov %v4015_v24  ;;  %v4026_v61 = vmov %v4011_v62  ;;  %v1306_v37 = vadd.f32 %v3101_v27, %v1300_v55  ;;  %v4028_v19 = vmov %v4012_v7 }
 0x18d   : > { %v1242_v4 = vmul.f32 %v4025_v8, %v2978_v11  ;;  %v1310_v33 = vmul.f32 %v4026_v61, %v3961_v34  ;;  %v1232_v3 = vadd.f32 %v1230_v25, %v1226_v32  ;;  %v1323_v21 = vadd.f32 %v1321_v30, %v1317_v43  ;;  %1137 = vrot.lane.b32.xlu1 %v1132_v15, %s1984_s7  ;;  %v4040_v25 = vld [vmem:[#allocation94_spill] sm:$0xff]  ;;  %v4045_v32 = vld [vmem:[#allocation116_spill] sm:$0xff] }
 0x18e   : > { %v1316_v28 = vmul.f32 %v4028_v19, %v2849_v60  ;;  %v1249_v31 = vadd.f32 %v1247_v58, %v1243_v40  ;;  %v4029_v62 = vstv %s2550_s17  ;;  %v4030_v18 = vmov %v4016_v42  ;;  %v4046_v43 = vld [vmem:[#allocation109_spill] sm:$0xff]  ;;  %s4051_s17 = sld [smem:[#allocation85_spill]] }
 0x18f   : > { %v1259_v13 = vmul.f32 %v4029_v62, %v3045_v29  ;;  %v1248_v46 = vmul.f32 %v4030_v18, %v2951_v39  ;;  %v4032_v34 = vmov %v4019_v26  ;;  %v1238_v7 = vadd.f32 %v1236_v20, %v1232_v3  ;;  %v4047_v30 = vld [vmem:[#allocation117_spill] sm:$0xff] }
 0x190   : > { %v1254_v12 = vmul.f32 %v4032_v34, %v3011_v2  ;;  %v4034_v27 = vrot.slane %v4033_v38, %v2210_v50  ;;  %v4035_v60 = vstv %s2563_s18  ;;  %v1312_v56 = vadd.f32 %v1310_v33, %v1306_v37  ;;  %s4067_s18 = sld [smem:[#allocation92_spill]] }
 0x191   : > { %v1359_v6 = vmul.f32 %v4035_v60, %v2955_v35  ;;  %v1255_v1 = vadd.f32 %v1253_v23, %v1249_v31  ;;  %v4037_v24 = vmov %v4029_v62  ;;  %v4038_v42 = vstv %s2505_s8 }
 0x192   : > { %v1339_v57 = vadd.f32 %v4034_v27, %v1323_v21  ;;  %v1260_v52 = vmul.f32 %v4037_v24, %v3030_v41  ;;  %v1365_v58 = vmul.f32 %v4038_v42, %v2779_v36  ;;  %v4039_v53 = vstv %s4027_s19 }
 0x193   : > { %v1371_v47 = vmul.f32 %v4039_v53, %v2991_v63  ;;  %v1244_v54 = vadd.f32 %v1242_v4, %v1238_v7  ;;  %v4041_v0 = vrot.slane %v4040_v25, %v2210_v50  ;;  %v1318_v48 = vadd.f32 %v1316_v28, %v1312_v56  ;;  %v4052_v4 = vld [vmem:[#allocation98_spill] sm:$0xff] }
 0x194   : > { %v4043_v26 = vmov %v4022_v16  ;;  %v1261_v14 = vadd.f32 %v1259_v13, %v1255_v1  ;;  %v4044_v20 = vstv %s4031_s2  ;;  %v943_v16 = vadd.f32 %v4046_v43, %v4045_v32 }
 0x195   : > { %v1355_v59 = vadd.f32 %v4041_v0, %v1339_v57  ;;  %v1322_v23 = vmul.f32 %v4043_v26, %v3973_v17  ;;  %v1377_v45 = vmul.f32 %v4044_v20, %v2974_v22  ;;  %v944_v5 = vadd.f32 %v4048_v9, %v4047_v30 }
 0x196   : > { %v1250_v55 = vadd.f32 %v1248_v46, %v1244_v54  ;;  %v4050_v40 = vstv %s4036_s4  ;;  %1265 = vrot.lane.b32.xlu0 %v1261_v14, %s1985_s20  ;;  %v4053_v61 = vrot.slane %v4052_v4, %v2210_v50  ;;  %v4054_v3 = vrot.slane %v4052_v4, %v2208_v49 }
 0x197   : > { %v1361_v15 = vadd.f32 %v1359_v6, %v1355_v59  ;;  %v1383_v17 = vmul.f32 %v4050_v40, %v3026_v51  ;;  %v1324_v8 = vadd.f32 %v1322_v23, %v1318_v48  ;;  %v4055_v37 = vstv %s4042_s3 }
 0x198   : > { %v959_v33 = vadd.f32 %v4053_v61, %v943_v16  ;;  %v960_v21 = vadd.f32 %v4054_v3, %v944_v5  ;;  %v979_v19 = vmul.f32 %v4055_v37, %v2955_v35  ;;  %v4056_v28 = vmov %v4055_v37 }
 0x199   : > { %v980_v31 = vmul.f32 %v4056_v28, %v2945_v10  ;;  %v1256_v62 = vadd.f32 %v1254_v12, %v1250_v55  ;;  %v1367_v13 = vadd.f32 %v1365_v58, %v1361_v15  ;;  %v4058_v18 = vrot.slane %v4033_v38, %v2208_v49 }
 0x19a   : > { %v4059_v34 = vmov %v4035_v60  ;;  %v4060_v27 = vstv %s4049_s5  ;;  %v4061_v60 = vld [vmem:[#allocation99_spill] sm:$0xff]  ;;  %v4064_v1 = vstv %s4051_s17  ;;  %v4068_v59 = vstv %s4057_s25 }
 0x19b   : > { %v1340_v46 = vadd.f32 %v4058_v18, %v1324_v8  ;;  %v1360_v7 = vmul.f32 %v4059_v34, %v2945_v10  ;;  %v1389_v57 = vmul.f32 %v4060_v27, %v3045_v29  ;;  %v4062_v35 = vrot.slane %v4061_v60, %v2210_v50 }
 0x19c   : > { %v4063_v12 = vrot.slane %v4061_v60, %v2208_v49  ;;  %v985_v38 = vmul.f32 %v4064_v1, %v2779_v36  ;;  %v1262_v24 = vadd.f32 %v1260_v52, %v1256_v62  ;;  %v1373_v42 = vadd.f32 %v1371_v47, %v1367_v13 }
 0x19d   : > { %v975_v6 = vadd.f32 %v4062_v35, %v959_v33  ;;  %v4065_v10 = vrot.slane %v4040_v25, %v2208_v49  ;;  %v4066_v53 = vmov %v4064_v1  ;;  %v991_v48 = vmul.f32 %v4068_v59, %v2991_v63 }
 0x19e   : > { %v976_v56 = vadd.f32 %v4063_v12, %v960_v21  ;;  %v986_v50 = vmul.f32 %v4066_v53, %v2783_v44  ;;  %v4069_v26 = vmov %v4068_v59  ;;  %1267 = vrot.lane.b32.xlu1 %v1262_v24, %s1985_s20  ;;  %v1379_v52 = vadd.f32 %v1377_v45, %v1373_v42  ;;  %v329_v53 = vld [vmem:[#allocation9 + $0x10] sm:$0x3f] }
 0x19f   : > { %v1356_v58 = vadd.f32 %v4065_v10, %v1340_v46  ;;  %v981_v54 = vadd.f32 %v979_v19, %v975_v6  ;;  %v992_v36 = vmul.f32 %v4069_v26, %v2978_v11  ;;  %v4071_v49 = vstv %s2505_s8  ;;  %s1986_s8 = smov 80  }
 0x1a0   : > { %v982_v0 = vadd.f32 %v980_v31, %v976_v56  ;;  %v1366_v25 = vmul.f32 %v4071_v49, %v2783_v44  ;;  %v4072_v23 = vstv %s4027_s19  ;;  %v1008_v43 = vstv %s3377_s6 }
 0x1a1   : > { %v1362_v47 = vadd.f32 %v1360_v7, %v1356_v58  ;;  %v1372_v14 = vmul.f32 %v4072_v23, %v2978_v11  ;;  %v987_v20 = vadd.f32 %v985_v38, %v981_v54  ;;  %v1385_v63 = vadd.f32 %v1383_v17, %v1379_v52 }
 0x1a2   : > { %v988_v32 = vadd.f32 %v986_v50, %v982_v0  ;;  %v4073_v30 = vstv %s4067_s18  ;;  %v4075_v44 = vstv %s4070_s10  ;;  %v4077_v17 = vstv %s4031_s2  ;;  %v330_v50 = vld [vmem:[#allocation9 + $0x18] sm:$0x3f] }
 0x1a3   : > { %v1368_v16 = vadd.f32 %v1366_v25, %v1362_v47  ;;  %v997_v9 = vmul.f32 %v4073_v30, %v2974_v22  ;;  %v4074_v5 = vmov %v4073_v30  ;;  %v993_v55 = vadd.f32 %v991_v48, %v987_v20 }
 0x1a4   : > { %v998_v45 = vmul.f32 %v4074_v5, %v2951_v39  ;;  %v994_v15 = vadd.f32 %v992_v36, %v988_v32  ;;  %v1003_v40 = vmul.f32 %v4075_v44, %v3026_v51  ;;  %v4076_v8 = vmov %v4075_v44 }
 0x1a5   : > { %v1004_v11 = vmul.f32 %v4076_v8, %v3011_v2  ;;  %v1391_v4 = vadd.f32 %v1389_v57, %v1385_v63  ;;  %v1374_v61 = vadd.f32 %v1372_v14, %v1368_v16  ;;  %v1378_v33 = vmul.f32 %v4077_v17, %v2951_v39  ;;  %v1801_v16 = vld [vmem:[#allocation9 + $0x8] sm:$0xff] }
 0x1a6   : > { %v4078_v3 = vstv %s4036_s4  ;;  %v999_v21 = vadd.f32 %v997_v9, %v993_v55  ;;  %v1000_v37 = vadd.f32 %v998_v45, %v994_v15  ;;  %v1009_v19 = vmul.f32 %v1008_v43, %v3045_v29 }
 0x1a7   : > { %v1384_v22 = vmul.f32 %v4078_v3, %v3011_v2  ;;  %v1010_v28 = vmul.f32 %v1008_v43, %v3030_v41  ;;  %1395 = vrot.lane.b32.xlu0 %v1391_v4, %s1986_s8  ;;  %v1380_v51 = vadd.f32 %v1378_v33, %v1374_v61  ;;  %v4079_v31 = vmov %v4060_v27  ;;  %v1800_v43 = vld [vmem:[#allocation9] sm:$0xff] }
 0x1a8   : > { %v1390_v62 = vmul.f32 %v4079_v31, %v3030_v41  ;;  %v1005_v13 = vadd.f32 %v1003_v40, %v999_v21  ;;  %v1006_v18 = vadd.f32 %v1004_v11, %v1000_v37 }
 0x1a9   : > { %v1386_v46 = vadd.f32 %v1384_v22, %v1380_v51 }
 0x1aa   : > { %v1011_v34 = vadd.f32 %v1009_v19, %v1005_v13  ;;  %v1012_v39 = vadd.f32 %v1010_v28, %v1006_v18 }
 0x1ab   : > { %v1392_v7 = vadd.f32 %v1390_v62, %v1386_v46 }
 0x1ac   : > { %v1015_v49 = vrot.slane %v1011_v34, 6  ;;  %v1016_v25 = vrot.slane %v1012_v39, 6 }
 0x1ad   : > { %1397 = vrot.lane.b32.xlu1 %v1392_v7, %s1986_s8 }
 0x1ae   : > { %v1019_v40 = vmul.f32 %v1015_v49, %v329_v53  ;;  %v1020_v8 = vmul.f32 %v1016_v25, %v330_v50 }
 0x1b0   : > { %v1023_v37 = vrot.slane %v1019_v40, 3  ;;  %v1024_v19 = vrot.slane %v1020_v8, 3 }
 0x1ca   : > { %v635_v2 = vpop.permute.xlu0 %634 }
 0x1cd   : > { %v639_v27 = vpop.permute.xlu1 %638 }
 0x1ce   : > { %v641_v24 = vsel %vm640_vm10, %v639_v27, %v635_v2  ;;  %v643_v42 = vsel %vm640_vm10, %v635_v2, %v639_v27 }
 0x1cf   : > { %v645_v59 = vrot.slane %v643_v42, 1  ;;  %v646_v48 = vrot.slane %v641_v24, 1 }
 0x1d1   : > { %v759_v57 = vpop.permute.xlu0 %758  ;;  %v649_v63 = vmul.f32 %v1800_v43, %v645_v59  ;;  %v650_v30 = vmul.f32 %v1801_v16, %v646_v48 }
 0x1df   : > { %v763_v60 = vpop.permute.xlu1 %762 }
 0x1e0   : > { %v765_v1 = vsel %vm764_vm9, %v763_v60, %v759_v57  ;;  %v768_v38 = vsel %vm764_vm9, %v759_v57, %v763_v60 }
 0x1e1   : > { %v769_v54 = vmul.f32 %v768_v38, %v329_v53  ;;  %v770_v0 = vmul.f32 %v765_v1, %v330_v50 }
 0x1e3   : > { %v773_v20 = vrot.slane %v769_v54, 1  ;;  %v774_v32 = vrot.slane %v770_v0, 1 }
 0x1e5   : > { %v777_v11 = vadd.f32 %v773_v20, %v649_v63  ;;  %v778_v4 = vadd.f32 %v774_v32, %v650_v30 }
 0x1e8   : > { %v885_v29 = vpop.permute.xlu0 %884 }
 0x1f0   : > { %v889_v35 = vpop.permute.xlu1 %888 }
 0x1f1   : > { %v891_v6 = vsel %vm890_vm8, %v889_v35, %v885_v29  ;;  %v893_v12 = vsel %vm890_vm8, %v885_v29, %v889_v35 }
 0x1f2   : > { %v895_v10 = vrot.slane %v893_v12, 7  ;;  %v896_v58 = vrot.slane %v891_v6, 7 }
 0x1f4   : > { %v899_v26 = vmul.f32 %v895_v10, %v329_v53  ;;  %v900_v36 = vmul.f32 %v896_v58, %v330_v50 }
 0x1f6   : > { %v903_v45 = vrot.slane %v899_v26, 2  ;;  %v904_v55 = vrot.slane %v900_v36, 2  ;;  %v4083_v36 = vld [vmem:[#allocation28_spill] sm:$0xff] }
 0x1f7   : > { %v1136_v56 = vpop.permute.xlu0 %1135 }
 0x1f8   : > { %v907_v33 = vadd.f32 %v903_v45, %v777_v11  ;;  %v908_v3 = vadd.f32 %v904_v55, %v778_v4 }
 0x1fa   : > { %v1027_v62 = vadd.f32 %v1023_v37, %v907_v33  ;;  %v1028_v13 = vadd.f32 %v1024_v19, %v908_v3 }
 0x1ff   : > { %v1138_v41 = vpop.permute.xlu1 %1137 }
 0x200   : > { %v1140_v23 = vsel %vm1139_vm11, %v1136_v56, %v1138_v41  ;;  %v1143_v14 = vsel %vm1139_vm11, %v1138_v41, %v1136_v56 }
 0x201   : > { %v1145_v15 = vrot.slane %v1140_v23, 5  ;;  %v1146_v44 = vrot.slane %v1143_v14, 5 }
 0x203   : > { %v1149_v22 = vmul.f32 %v1145_v15, %v329_v53  ;;  %v1150_v21 = vmul.f32 %v1146_v44, %v330_v50 }
 0x205   : > { %v1153_v18 = vrot.slane %v1149_v22, 4  ;;  %v1154_v46 = vrot.slane %v1150_v21, 4 }
 0x207   : > { %v1157_v29 = vadd.f32 %v1153_v18, %v1027_v62  ;;  %v1158_v35 = vadd.f32 %v1154_v46, %v1028_v13 }
 0x208   : > { %v1266_v52 = vpop.permute.xlu0 %1265 }
 0x210   : > { %v1268_v47 = vpop.permute.xlu1 %1267 }
 0x211   : > { %v1270_v9 = vsel %vm1269_vm12, %v1266_v52, %v1268_v47  ;;  %v1273_v5 = vsel %vm1269_vm12, %v1268_v47, %v1266_v52 }
 0x212   : > { %v1275_v61 = vrot.slane %v1270_v9, 4  ;;  %v1276_v17 = vrot.slane %v1273_v5, 4 }
 0x214   : > { %v1279_v28 = vmul.f32 %v1275_v61, %v329_v53  ;;  %v1280_v51 = vmul.f32 %v1276_v17, %v330_v50 }
 0x216   : > { %v1283_v2 = vrot.slane %v1279_v28, 5  ;;  %v1284_v27 = vrot.slane %v1280_v51, 5 }
 0x218   : > { %v1287_v56 = vadd.f32 %v1283_v2, %v1157_v29  ;;  %v1288_v41 = vadd.f32 %v1284_v27, %v1158_v35 }
 0x219   : > { %v1396_v31 = vpop.permute.xlu0 %1395 }
 0x21f   : > { %v1398_v34 = vpop.permute.xlu1 %1397 }
 0x220   : > { %v1400_v39 = vsel %vm1399_vm13, %v1396_v31, %v1398_v34  ;;  %v1403_v7 = vsel %vm1399_vm13, %v1398_v34, %v1396_v31 }
 0x221   : > { %v1405_v57 = vrot.slane %v1400_v39, 3  ;;  %v1406_v60 = vrot.slane %v1403_v7, 3 }
 0x223   : > { %v1409_v6 = vmul.f32 %v1405_v57, %v329_v53  ;;  %v1410_v12 = vmul.f32 %v1406_v60, %v330_v50 }
 0x225   : > { %v1413_v1 = vrot.slane %v1409_v6, 6  ;;  %v1414_v38 = vrot.slane %v1410_v12, 6 }
 0x227   : > { %v1417_v24 = vadd.f32 %v1413_v1, %v1287_v56  ;;  %v1418_v42 = vadd.f32 %v1414_v38, %v1288_v41 }
 0x229   : > { %v1681_v10 = vmul.f32 -1.442695, %v1417_v24  ;;  %v1682_v58 = vmul.f32 -1.442695, %v1418_v42 }
 0x22b   : > { %1792 = vpow2.f32 %v1681_v10 }
 0x22c   : > { %1794 = vpow2.f32 %v1682_v58 }
 0x235   : > { %v1793_v54 = vpop.eup %1792 }
 0x236   : > { %v1795_v0 = vpop.eup %1794  ;;  %v1425_v59 = vadd.f32 1.0, %v1793_v54 }
 0x237   : > { %v1426_v48 = vadd.f32 1.0, %v1795_v0 }
 0x238   : > { %1796 = vrcp.f32 %v1425_v59 }
 0x239   : > { %1798 = vrcp.f32 %v1426_v48 }
 0x242   : > { %v1797_v53 = vpop.eup %1796 }
 0x243   : > { %v1799_v50 = vpop.eup %1798 }
 0x244   : > { %v1433_v26 = vcombine.high %v1797_v53, %v1799_v50 }
 0x246   : > { %v1440_v52 = vrot.slane %v1433_v26, %v4083_v36 }
 0x248   : > { %v1441_v47 = vcombine.high %v1440_v52, %v1440_v52 }
 0x24a   : > { %v1448_v49 = vrot.slane %v1441_v47, %v4083_v36 }
 0x24c   : > { %v1449_v25 = vcombine.high %v1448_v49, %v1448_v49 }
 0x24e   : > { %1451 = vst.msk [vmem:[%s231_s16] sm:$0x3] %vm2190_vm1, %v1449_v25 }
 0x24f   : > { %1888 = shalt.err (!%p1885_p11)
}
 0x250   : > { %s1889_s9 = scalar_lea.hbm %s3461_s27, 32  ;;  %s1893_s19 = scalar_lea.hbm %s4084_s1, 64 }
 0x251   : > { %p1890_p7 = scmp.ne.s32.totalorder %s3461_s27, %s1889_s9  ;;  %p1894_p4 = scmp.lt.u32.totalorder %s3461_s27, %s4084_s1 }
 0x252   : > { %p1895_p9 = scmp.lt.u32.totalorder %s1893_s19, %s1889_s9  ;;  %p1897_p8 = scmp.lt.u32.totalorder %s1889_s9, %s3461_s27 }
 0x253   : > { %p1891_p12 = pnand %p1890_p7, %p4086_p2 }
 0x254   : > { %p1896_p5 = por %p1895_p9, %p1894_p4 }
 0x255   : > { %p1892_p1 = pneg %p1891_p12 }
 0x256   : > { %p1898_p10 = por %p1897_p8, %p1896_p5 }
 0x258   : > { %p1899_p13 = pnand %p1898_p10, %p1892_p1 }
 0x25a   : > { %1902 = shalt.err (!%p1899_p13)
}
 0x25b   : > { %1700 = dma.vmem_to_hbm [thread:$0]  (%p4086_p2), %s3463_s15, 32, %s3461_s27, %s1453_s23  }
 0x25c PF: > { %s4087_s3 = sld [smem:[#allocation16_spill]]  ;;  %s4088_s5 = sld [smem:[#allocation22_spill]] }
 0x25d   : > { %s4089_s6 = sld [smem:[#allocation21_spill]] }
 0x262   : > { %s1479_s17 = sand.u32 1, %s4087_s3   ;;  %p4090_p0 = scmp.ne.s32.totalorder %s4088_s5, 0 }
 0x263   : > { %p4091_p6 = scmp.ge.s32.totalorder %s4089_s6, 2  ;;  %s1480_s20 = scalar_lea.sflag [#allocation6], %s1479_s17 }
 0x265   : > { %p1714_p3 = pnand %p4091_p6, %p4090_p0 }
 0x267   : > { %1940 = dma.done.wait (!%p1714_p3), %s1480_s20, 32  }
 0x268   : > { %1942 = vsyncadd (!%p1714_p3), %s1480_s20, 4294967264  ;;  %s21_s17 = sadd.s32 1, %s4089_s6   ;;  %s4092_s12 = sld [smem:[#allocation17_spill]] }
 0x269   : > { %p18_p11 = scmp.ge.s32.totalorder %s21_s17, 4   ;;  %s4093_s13 = sld [smem:[#allocation18_spill]] }
 0x26a   : > { %s4094_s14 = sld [smem:[#allocation25_spill]]  ;;  %s4095_s15 = sld [smem:[#allocation20_spill]] }
 0x26b   : > { %s4096_s16 = sld [smem:[#allocation23_spill]]  ;;  %20 = sbr.rel (!%p18_p11) target bundleno = 13 (0xd), region = 94 }
 0x272   :  { %1485 = vsyncpa [#allocation5], 1 }
 0x273   :  { %1487 = vsyncpa [#allocation5 + $0x1], 1 }
 0x274   :  { %1488 = vsyncpa [#allocation10], 1 }
 0x275   :  { %1489 = vsyncpa [#allocation6], 1 }
 0x276   :  { %1491 = vsyncpa [#allocation6 + $0x1], 1 }
 0x277   :  { %1492 = vsyncpa [#allocation7], 1 }
 0x278   :  { %1494 = vsyncpa [#allocation7 + $0x1], 1 }

</bundles_post_ra>
